<compile_context>
chip_gen: v7x
topology: tpu7x:2x2x1
jax: 0.10.0
libtpu: 0.0.40
codegen_flags: <defaults>
</compile_context>

<pallas_src>
from functools import partial

import numpy as np
import jax
import jax.numpy as jnp
from jax import lax
from jax.experimental import pallas as pl
from jax.experimental.pallas import tpu as pltpu

BN_EPS = 1e-5


# ----------------------------------------------------------------------------
# Pallas kernel: fused (re-parameterized) 3x3x3 conv + bias + ReLU, one D-tile
# ----------------------------------------------------------------------------
def _tap(start, size, stride):
    return pl.ds(start, size) if stride == 1 else pl.ds(start, size, stride)


def _repvgg_block_kernel(x_ref, w_ref, b_ref, o_ref, col_ref, *, stride, out_tile):
    # x_ref:  (TD_in, Hp, Wp, Cin)   haloed, zero-padded input depth-slab (NDHWC)
    # w_ref:  (K_pad, Cout)          packed equivalent weight (K = 27*Cin, zero pad rows)
    # b_ref:  (1, Cout)              equivalent bias (f32)
    # o_ref:  (S, Cout)              output depth tile, spatial rows flattened
    # col_ref:(S, K_pad)             im2col scratch, S = TDo*Ho*Wo
    sd, sh, sw = stride
    TDo, Ho, Wo = out_tile
    Cin = x_ref.shape[-1]
    S, Cout = o_ref.shape
    K = 27 * Cin
    K_pad = col_ref.shape[-1]

    # Keep the zero-padded K lanes defined (their weight rows are zero anyway).
    # Scratch is per-core VMEM, so this must not be guarded by a global
    # "first grid step" pl.when (megacore would leave one core uninitialized).
    if K_pad > K:
        col_ref[:, pl.ds(K, K_pad - K)] = jnp.zeros((S, K_pad - K), col_ref.dtype)

    # im2col: 27 shifted (and strided) views of the input slab, packed along the
    # lane axis of the scratch -> a single wide-K MXU matmul below.
    idx = 0
    for kd in range(3):
        for kh in range(3):
            for kw in range(3):
                patch = x_ref[_tap(kd, TDo, sd),
                              _tap(kh, Ho, sh),
                              _tap(kw, Wo, sw), :]          # (TDo, Ho, Wo, Cin)
                col_ref[:, pl.ds(idx, Cin)] = (
                    patch.reshape(S, Cin).astype(col_ref.dtype))
                idx += Cin

    acc = jnp.dot(col_ref[...], w_ref[...],
                  preferred_element_type=jnp.float32)       # (S, Cout), one matmul
    acc = jnp.maximum(acc + b_ref[...], 0.0)                # fused bias + ReLU
    o_ref[...] = acc.astype(o_ref.dtype)                    # direct, no relayout


# ----------------------------------------------------------------------------
# Tiling / wrapper (activations stay NDHWC across the whole block chain)
# ----------------------------------------------------------------------------
def _padded_block_bytes(shape, itemsize):
    """VMEM footprint of a buffer after (8,128) tiling of the last two dims."""
    s = list(shape)
    s[-1] = -(-s[-1] // 128) * 128
    if len(s) >= 2:
        s[-2] = -(-s[-2] // 8) * 8
    return int(np.prod(s)) * itemsize


def _pick_d_tile(Do, sd, n_batch, Hp, Wp, Cin, Ho, Wo, Cout, K_pad,
                 in_itemsize, col_itemsize, out_itemsize, budget):
    """Largest output-depth tile whose double-buffered blocks fit the VMEM
    budget, preferring >=4 total grid steps (2 TCs on v7x + pipeline headroom)."""
    def vmem_est(td):
        td_in = (td - 1) * sd + 3
        s = td * Ho * Wo
        return (2 * _padded_block_bytes((td_in, Hp, Wp, Cin), in_itemsize)
                + 2 * _padded_block_bytes((s, Cout), out_itemsize)
                + _padded_block_bytes((s, K_pad), col_itemsize)
                + _padded_block_bytes((K_pad, Cout), col_itemsize))

    divisors = [d for d in range(1, Do + 1) if Do % d == 0]
    fitting = [d for d in divisors if vmem_est(d) <= budget] or [1]
    good = [d for d in fitting if n_batch * (Do // d) >= 4]
    td = max(good) if good else max(fitting)
    return td, vmem_est(td)


def repvgg_block_apply_ndhwc(x, w_mat, b, stride, cout,
                             compute_dtype=jnp.float32,
                             vmem_budget=8 * 2 ** 20):
    """One fused RepVGGplusBlock3D. x: (N, D, H, W, Cin) -> (N, Do, Ho, Wo, Cout)."""
    N, D, H, W, Cin = x.shape
    sd, sh, sw = stride
    Do = (D - 1) // sd + 1
    Ho = (H - 1) // sh + 1
    Wo = (W - 1) // sw + 1
    Hp, Wp = H + 2, W + 2
    K_pad = w_mat.shape[0]

    TDo, est = _pick_d_tile(
        Do, sd, N, Hp, Wp, Cin, Ho, Wo, cout, K_pad,
        jnp.dtype(x.dtype).itemsize, jnp.dtype(compute_dtype).itemsize,
        jnp.dtype(x.dtype).itemsize, vmem_budget)
    nT = Do // TDo
    TD_in = (TDo - 1) * sd + 3
    S = TDo * Ho * Wo

    # zero-pad (k=3, p=1) and cut overlapping (haloed) depth slabs so the
    # D-tile grid axis can use plain Blocked indexing with auto-pipelining.
    xp = jnp.pad(x, ((0, 0), (1, 1), (1, 1), (1, 1), (0, 0)))
    slabs = jnp.stack(
        [xp[:, t * TDo * sd: t * TDo * sd + TD_in] for t in range(nT)], axis=1)
    # slabs: (N, nT, TD_in, Hp, Wp, Cin)

    out = pl.pallas_call(
        partial(_repvgg_block_kernel, stride=(sd, sh, sw), out_tile=(TDo, Ho, Wo)),
        out_shape=jax.ShapeDtypeStruct((N, nT, S, cout), x.dtype),
        grid_spec=pltpu.PrefetchScalarGridSpec(
            num_scalar_prefetch=0,
            grid=(N, nT),
            in_specs=[
                pl.BlockSpec((None, None, TD_in, Hp, Wp, Cin),
                             lambda n, t: (n, t, 0, 0, 0, 0)),
                pl.BlockSpec((K_pad, cout), lambda n, t: (0, 0)),
                pl.BlockSpec((1, cout), lambda n, t: (0, 0)),
            ],
            out_specs=pl.BlockSpec((None, None, S, cout),
                                   lambda n, t: (n, t, 0, 0)),
            scratch_shapes=[pltpu.VMEM((S, K_pad), compute_dtype)],
        ),
        compiler_params=pltpu.CompilerParams(
            dimension_semantics=("parallel", "parallel"),
            vmem_limit_bytes=int(min(48 * 2 ** 20, max(8 * 2 ** 20, 2 * est))),
        ),
    )(slabs, w_mat, b)

    # (N, nT, TDo*Ho*Wo, Cout) -> (N, Do, Ho, Wo, Cout): contiguous, free reshape.
    return out.reshape(N, Do, Ho, Wo, cout)


# ----------------------------------------------------------------------------
# Parameter init (deterministic) and conv+BN fusion (glue, plain JAX)
# ----------------------------------------------------------------------------
def _init_bn(keys, c):
    return dict(
        gamma=1.0 + 0.1 * jax.random.normal(keys[0], (c,), jnp.float32),
        beta=0.1 * jax.random.normal(keys[1], (c,), jnp.float32),
        mean=0.1 * jax.random.normal(keys[2], (c,), jnp.float32),
        var=jax.random.uniform(keys[3], (c,), jnp.float32, 0.5, 1.5),
    )


def init_repvgg_block_params(key, cin, cout):
    ks = jax.random.split(key, 14)
    return dict(
        w_dense=0.1 * jax.random.normal(ks[0], (cout, cin, 3, 3, 3), jnp.float32),
        w_1x1=0.1 * jax.random.normal(ks[1], (cout, cin, 1, 1, 1), jnp.float32),
        bn_dense=_init_bn(ks[2:6], cout),
        bn_1x1=_init_bn(ks[6:10], cout),
        bn_id=_init_bn(ks[10:14], cout),
    )


def _fuse_conv_bn(w, bn):
    std = jnp.sqrt(bn['var'] + BN_EPS)
    t = bn['gamma'] / std
    return w * t[:, None, None, None, None], bn['beta'] - bn['mean'] * t


def equivalent_kernel_bias(p, has_identity):
    w3, b3 = _fuse_conv_bn(p['w_dense'], p['bn_dense'])
    w1, b1 = _fuse_conv_bn(p['w_1x1'], p['bn_1x1'])
    w = w3 + jnp.pad(w1, ((0, 0), (0, 0), (1, 1), (1, 1), (1, 1)))
    b = b3 + b1
    if has_identity:
        cout, cin = p['w_dense'].shape[:2]
        idw = jnp.zeros((cout, cin, 3, 3, 3), jnp.float32)
        idw = idw.at[jnp.arange(cout), jnp.arange(cin), 1, 1, 1].set(1.0)
        wi, bi = _fuse_conv_bn(idw, p['bn_id'])
        w, b = w + wi, b + bi
    return w, b


def pack_weight_matrix(w_eq, compute_dtype):
    """(Cout, Cin, 3,3,3) -> (K_pad, Cout), row order ((kd*3+kh)*3+kw)*Cin + ci."""
    cout, cin = w_eq.shape[:2]
    k = 27 * cin
    k_pad = -(-k // 128) * 128
    w_t = jnp.transpose(w_eq, (2, 3, 4, 1, 0)).reshape(k, cout)
    w_t = jnp.pad(w_t, ((0, k_pad - k), (0, 0)))
    return w_t.astype(compute_dtype)


# ----------------------------------------------------------------------------
# StackedConvBlocks equivalent
# ----------------------------------------------------------------------------
class StackedConvBlocksPallas:
    def __init__(self, num_convs, input_channels, output_channels,
                 kernel_size, initial_stride, key, compute_dtype=jnp.float32):
        # compute_dtype=jnp.bfloat16 is recommended on v6e/v7x (f32 accumulate).
        assert kernel_size == 3, "RepVGGplusBlock3D requires padding==1 (kernel 3)"
        if not isinstance(output_channels, (tuple, list)):
            output_channels = [output_channels] * num_convs
        if not isinstance(initial_stride, (tuple, list)):
            initial_stride = (initial_stride,) * 3
        strides = [tuple(initial_stride)] + [(1, 1, 1)] * (num_convs - 1)
        cins = [input_channels] + list(output_channels[:-1])
        keys = jax.random.split(key, num_convs)

        self.compute_dtype = compute_dtype
        self.blocks = []
        for i in range(num_convs):
            p = init_repvgg_block_params(keys[i], cins[i], output_channels[i])
            has_id = (cins[i] == output_channels[i]) and strides[i] == (1, 1, 1)
            w_eq, b_eq = equivalent_kernel_bias(p, has_id)
            self.blocks.append(dict(
                w_mat=pack_weight_matrix(w_eq, compute_dtype),
                b=b_eq.reshape(1, -1).astype(jnp.float32),
                stride=strides[i], cout=output_channels[i],
                params=p, has_identity=has_id))

    def __call__(self, x_ncdhw):
        x = jnp.transpose(x_ncdhw, (0, 2, 3, 4, 1))   # NCDHW -> NDHWC, once
        for blk in self.blocks:
            x = repvgg_block_apply_ndhwc(x, blk['w_mat'], blk['b'],
                                         blk['stride'], blk['cout'],
                                         self.compute_dtype)
        return jnp.transpose(x, (0, 4, 1, 2, 3))      # NDHWC -> NCDHW, once


# ----------------------------------------------------------------------------
# Pure-JAX reference (branch-by-branch, eval-mode BN) for verification
# ----------------------------------------------------------------------------
def _bn_apply(x, bn):  # x: NCDHW
    g = bn['gamma'][None, :, None, None, None]
    be = bn['beta'][None, :, None, None, None]
    m = bn['mean'][None, :, None, None, None]
    v = bn['var'][None, :, None, None, None]
    return (x - m) / jnp.sqrt(v + BN_EPS) * g + be


def _conv3d(x, w, stride, padding):
    return lax.conv_general_dilated(
        x, w, window_strides=stride, padding=[(padding, padding)] * 3,
        dimension_numbers=("NCDHW", "OIDHW", "NCDHW"),
        precision=lax.Precision.HIGHEST)


def reference_block(x, p, stride, has_identity):
    y = _bn_apply(_conv3d(x, p['w_dense'], stride, 1), p['bn_dense'])
    y = y + _bn_apply(_conv3d(x, p['w_1x1'], stride, 0), p['bn_1x1'])
    if has_identity:
        y = y + _bn_apply(x, p['bn_id'])
    return jnp.maximum(y, 0.0)


# ----------------------------------------------------------------------------
if __name__ == "__main__":
    key = jax.random.PRNGKey(0)
    k_x, k_params = jax.random.split(key)

    # StackedConvBlocks(num_convs=2, conv_op=nn.Conv3d, input_channels=4,
    #                   output_channels=[8, 8], kernel_size=3, initial_stride=2,
    #                   use_checkpoint=False)
    N, Cin, D, H, W = 2, 4, 8, 8, 8
    num_convs = 2
    output_channels = [8, 8]
    initial_stride = 2

    x = jax.random.normal(k_x, (N, Cin, D, H, W), jnp.float32)   # NCDHW like PyTorch

    model = StackedConvBlocksPallas(num_convs, Cin, output_channels,
                                    kernel_size=3, initial_stride=initial_stride,
                                    key=k_params, compute_dtype=jnp.float32)
    y = model(x)
    y = jax.block_until_ready(y)

    # verify against the branch-by-branch reference
    xr = x
    for blk in model.blocks:
        xr = reference_block(xr, blk['params'], blk['stride'], blk['has_identity'])
    np.testing.assert_allclose(np.asarray(y), np.asarray(xr), rtol=1e-3, atol=1e-3)

    print("KERNEL_OK")
</pallas_src>

<mosaic_0001>
module attributes {stable_mosaic.version = 11 : i64} {
  func.func @_repvgg_block_kernel(%arg0: i32, %arg1: i32, %arg2: memref<1x1x5x10x10x4xf32, #tpu.memory_space<vmem>>, %arg3: memref<128x8xf32, #tpu.memory_space<vmem>>, %arg4: memref<1x8xf32, #tpu.memory_space<vmem>>, %arg5: memref<1x1x32x8xf32, #tpu.memory_space<vmem>>, %arg6: memref<32x128xf32, #tpu.memory_space<vmem>>) attributes {dimension_semantics = [#tpu.dimension_semantics<parallel>, #tpu.dimension_semantics<parallel>], iteration_bounds = array<i64: 2, 2>, scalar_prefetch = 0 : i64, scratch_operands = 1 : i64, tpu.core_type = #tpu.core_type<tc>, window_params = [{transform_indices = @transform_0, window_bounds = array<i64: 1, 1, 5, 10, 10, 4>}, {pipeline_mode = #tpu.pipeline_mode<synchronous>, transform_indices = @transform_1, window_bounds = array<i64: 128, 8>}, {pipeline_mode = #tpu.pipeline_mode<synchronous>, transform_indices = @transform_2, window_bounds = array<i64: 1, 8>}, {transform_indices = @transform_3, window_bounds = array<i64: 1, 1, 32, 8>}]} {
    %cst = arith.constant 0.000000e+00 : f32
    %0 = vector.broadcast %cst : f32 to vector<32x20xf32>
    %c0 = arith.constant 0 : index
    %c108 = arith.constant 108 : index
    %1 = vector.load %arg6[%c0, %c108] : memref<32x128xf32, #tpu.memory_space<vmem>>, vector<32x20xf32>
    tpu.vector_store %arg6[%c0, %c108], %0 {strides = array<i32>} : memref<32x128xf32, #tpu.memory_space<vmem>>, vector<32x20xf32>,
    %c0_0 = arith.constant 0 : index
    %c0_1 = arith.constant 0 : index
    %c0_2 = arith.constant 0 : index
    %c0_3 = arith.constant 0 : index
    %c0_4 = arith.constant 0 : index
    %c0_5 = arith.constant 0 : index
    %2 = tpu.strided_load %arg2[%c0_0, %c0_1, %c0_2, %c0_3, %c0_4, %c0_5] {strides = array<i32: 1, 1, 2, 2, 2, 1>} : memref<1x1x5x10x10x4xf32, #tpu.memory_space<vmem>>, vector<1x1x2x4x4x4xf32>
    %3 = vector.shape_cast %2 : vector<1x1x2x4x4x4xf32> to vector<2x4x4x4xf32>
    %4 = vector.shape_cast %3 : vector<2x4x4x4xf32> to vector<32x4xf32>
    %c0_6 = arith.constant 0 : index
    %c0_7 = arith.constant 0 : index
    %5 = vector.load %arg6[%c0_6, %c0_7] : memref<32x128xf32, #tpu.memory_space<vmem>>, vector<32x4xf32>
    tpu.vector_store %arg6[%c0_6, %c0_7], %4 {strides = array<i32>} : memref<32x128xf32, #tpu.memory_space<vmem>>, vector<32x4xf32>,
    %c0_8 = arith.constant 0 : index
    %c0_9 = arith.constant 0 : index
    %c0_10 = arith.constant 0 : index
    %c0_11 = arith.constant 0 : index
    %c1 = arith.constant 1 : index
    %c0_12 = arith.constant 0 : index
    %6 = tpu.strided_load %arg2[%c0_8, %c0_9, %c0_10, %c0_11, %c1, %c0_12] {strides = array<i32: 1, 1, 2, 2, 2, 1>} : memref<1x1x5x10x10x4xf32, #tpu.memory_space<vmem>>, vector<1x1x2x4x4x4xf32>
    %7 = vector.shape_cast %6 : vector<1x1x2x4x4x4xf32> to vector<2x4x4x4xf32>
    %8 = vector.shape_cast %7 : vector<2x4x4x4xf32> to vector<32x4xf32>
    %c0_13 = arith.constant 0 : index
    %c4 = arith.constant 4 : index
    %9 = vector.load %arg6[%c0_13, %c4] : memref<32x128xf32, #tpu.memory_space<vmem>>, vector<32x4xf32>
    tpu.vector_store %arg6[%c0_13, %c4], %8 {strides = array<i32>} : memref<32x128xf32, #tpu.memory_space<vmem>>, vector<32x4xf32>,
    %c0_14 = arith.constant 0 : index
    %c0_15 = arith.constant 0 : index
    %c0_16 = arith.constant 0 : index
    %c0_17 = arith.constant 0 : index
    %c2 = arith.constant 2 : index
    %c0_18 = arith.constant 0 : index
    %10 = tpu.strided_load %arg2[%c0_14, %c0_15, %c0_16, %c0_17, %c2, %c0_18] {strides = array<i32: 1, 1, 2, 2, 2, 1>} : memref<1x1x5x10x10x4xf32, #tpu.memory_space<vmem>>, vector<1x1x2x4x4x4xf32>
    %11 = vector.shape_cast %10 : vector<1x1x2x4x4x4xf32> to vector<2x4x4x4xf32>
    %12 = vector.shape_cast %11 : vector<2x4x4x4xf32> to vector<32x4xf32>
    %c0_19 = arith.constant 0 : index
    %c8 = arith.constant 8 : index
    %13 = vector.load %arg6[%c0_19, %c8] : memref<32x128xf32, #tpu.memory_space<vmem>>, vector<32x4xf32>
    tpu.vector_store %arg6[%c0_19, %c8], %12 {strides = array<i32>} : memref<32x128xf32, #tpu.memory_space<vmem>>, vector<32x4xf32>,
    %c0_20 = arith.constant 0 : index
    %c0_21 = arith.constant 0 : index
    %c0_22 = arith.constant 0 : index
    %c1_23 = arith.constant 1 : index
    %c0_24 = arith.constant 0 : index
    %c0_25 = arith.constant 0 : index
    %14 = tpu.strided_load %arg2[%c0_20, %c0_21, %c0_22, %c1_23, %c0_24, %c0_25] {strides = array<i32: 1, 1, 2, 2, 2, 1>} : memref<1x1x5x10x10x4xf32, #tpu.memory_space<vmem>>, vector<1x1x2x4x4x4xf32>
    %15 = vector.shape_cast %14 : vector<1x1x2x4x4x4xf32> to vector<2x4x4x4xf32>
    %16 = vector.shape_cast %15 : vector<2x4x4x4xf32> to vector<32x4xf32>
    %c0_26 = arith.constant 0 : index
    %c12 = arith.constant 12 : index
    %17 = vector.load %arg6[%c0_26, %c12] : memref<32x128xf32, #tpu.memory_space<vmem>>, vector<32x4xf32>
    tpu.vector_store %arg6[%c0_26, %c12], %16 {strides = array<i32>} : memref<32x128xf32, #tpu.memory_space<vmem>>, vector<32x4xf32>,
    %c0_27 = arith.constant 0 : index
    %c0_28 = arith.constant 0 : index
    %c0_29 = arith.constant 0 : index
    %c1_30 = arith.constant 1 : index
    %c1_31 = arith.constant 1 : index
    %c0_32 = arith.constant 0 : index
    %18 = tpu.strided_load %arg2[%c0_27, %c0_28, %c0_29, %c1_30, %c1_31, %c0_32] {strides = array<i32: 1, 1, 2, 2, 2, 1>} : memref<1x1x5x10x10x4xf32, #tpu.memory_space<vmem>>, vector<1x1x2x4x4x4xf32>
    %19 = vector.shape_cast %18 : vector<1x1x2x4x4x4xf32> to vector<2x4x4x4xf32>
    %20 = vector.shape_cast %19 : vector<2x4x4x4xf32> to vector<32x4xf32>
    %c0_33 = arith.constant 0 : index
    %c16 = arith.constant 16 : index
    %21 = vector.load %arg6[%c0_33, %c16] : memref<32x128xf32, #tpu.memory_space<vmem>>, vector<32x4xf32>
    tpu.vector_store %arg6[%c0_33, %c16], %20 {strides = array<i32>} : memref<32x128xf32, #tpu.memory_space<vmem>>, vector<32x4xf32>,
    %c0_34 = arith.constant 0 : index
    %c0_35 = arith.constant 0 : index
    %c0_36 = arith.constant 0 : index
    %c1_37 = arith.constant 1 : index
    %c2_38 = arith.constant 2 : index
    %c0_39 = arith.constant 0 : index
    %22 = tpu.strided_load %arg2[%c0_34, %c0_35, %c0_36, %c1_37, %c2_38, %c0_39] {strides = array<i32: 1, 1, 2, 2, 2, 1>} : memref<1x1x5x10x10x4xf32, #tpu.memory_space<vmem>>, vector<1x1x2x4x4x4xf32>
    %23 = vector.shape_cast %22 : vector<1x1x2x4x4x4xf32> to vector<2x4x4x4xf32>
    %24 = vector.shape_cast %23 : vector<2x4x4x4xf32> to vector<32x4xf32>
    %c0_40 = arith.constant 0 : index
    %c20 = arith.constant 20 : index
    %25 = vector.load %arg6[%c0_40, %c20] : memref<32x128xf32, #tpu.memory_space<vmem>>, vector<32x4xf32>
    tpu.vector_store %arg6[%c0_40, %c20], %24 {strides = array<i32>} : memref<32x128xf32, #tpu.memory_space<vmem>>, vector<32x4xf32>,
    %c0_41 = arith.constant 0 : index
    %c0_42 = arith.constant 0 : index
    %c0_43 = arith.constant 0 : index
    %c2_44 = arith.constant 2 : index
    %c0_45 = arith.constant 0 : index
    %c0_46 = arith.constant 0 : index
    %26 = tpu.strided_load %arg2[%c0_41, %c0_42, %c0_43, %c2_44, %c0_45, %c0_46] {strides = array<i32: 1, 1, 2, 2, 2, 1>} : memref<1x1x5x10x10x4xf32, #tpu.memory_space<vmem>>, vector<1x1x2x4x4x4xf32>
    %27 = vector.shape_cast %26 : vector<1x1x2x4x4x4xf32> to vector<2x4x4x4xf32>
    %28 = vector.shape_cast %27 : vector<2x4x4x4xf32> to vector<32x4xf32>
    %c0_47 = arith.constant 0 : index
    %c24 = arith.constant 24 : index
    %29 = vector.load %arg6[%c0_47, %c24] : memref<32x128xf32, #tpu.memory_space<vmem>>, vector<32x4xf32>
    tpu.vector_store %arg6[%c0_47, %c24], %28 {strides = array<i32>} : memref<32x128xf32, #tpu.memory_space<vmem>>, vector<32x4xf32>,
    %c0_48 = arith.constant 0 : index
    %c0_49 = arith.constant 0 : index
    %c0_50 = arith.constant 0 : index
    %c2_51 = arith.constant 2 : index
    %c1_52 = arith.constant 1 : index
    %c0_53 = arith.constant 0 : index
    %30 = tpu.strided_load %arg2[%c0_48, %c0_49, %c0_50, %c2_51, %c1_52, %c0_53] {strides = array<i32: 1, 1, 2, 2, 2, 1>} : memref<1x1x5x10x10x4xf32, #tpu.memory_space<vmem>>, vector<1x1x2x4x4x4xf32>
    %31 = vector.shape_cast %30 : vector<1x1x2x4x4x4xf32> to vector<2x4x4x4xf32>
    %32 = vector.shape_cast %31 : vector<2x4x4x4xf32> to vector<32x4xf32>
    %c0_54 = arith.constant 0 : index
    %c28 = arith.constant 28 : index
    %33 = vector.load %arg6[%c0_54, %c28] : memref<32x128xf32, #tpu.memory_space<vmem>>, vector<32x4xf32>
    tpu.vector_store %arg6[%c0_54, %c28], %32 {strides = array<i32>} : memref<32x128xf32, #tpu.memory_space<vmem>>, vector<32x4xf32>,
    %c0_55 = arith.constant 0 : index
    %c0_56 = arith.constant 0 : index
    %c0_57 = arith.constant 0 : index
    %c2_58 = arith.constant 2 : index
    %c2_59 = arith.constant 2 : index
    %c0_60 = arith.constant 0 : index
    %34 = tpu.strided_load %arg2[%c0_55, %c0_56, %c0_57, %c2_58, %c2_59, %c0_60] {strides = array<i32: 1, 1, 2, 2, 2, 1>} : memref<1x1x5x10x10x4xf32, #tpu.memory_space<vmem>>, vector<1x1x2x4x4x4xf32>
    %35 = vector.shape_cast %34 : vector<1x1x2x4x4x4xf32> to vector<2x4x4x4xf32>
    %36 = vector.shape_cast %35 : vector<2x4x4x4xf32> to vector<32x4xf32>
    %c0_61 = arith.constant 0 : index
    %c32 = arith.constant 32 : index
    %37 = vector.load %arg6[%c0_61, %c32] : memref<32x128xf32, #tpu.memory_space<vmem>>, vector<32x4xf32>
    tpu.vector_store %arg6[%c0_61, %c32], %36 {strides = array<i32>} : memref<32x128xf32, #tpu.memory_space<vmem>>, vector<32x4xf32>,
    %c0_62 = arith.constant 0 : index
    %c0_63 = arith.constant 0 : index
    %c1_64 = arith.constant 1 : index
    %c0_65 = arith.constant 0 : index
    %c0_66 = arith.constant 0 : index
    %c0_67 = arith.constant 0 : index
    %38 = tpu.strided_load %arg2[%c0_62, %c0_63, %c1_64, %c0_65, %c0_66, %c0_67] {strides = array<i32: 1, 1, 2, 2, 2, 1>} : memref<1x1x5x10x10x4xf32, #tpu.memory_space<vmem>>, vector<1x1x2x4x4x4xf32>
    %39 = vector.shape_cast %38 : vector<1x1x2x4x4x4xf32> to vector<2x4x4x4xf32>
    %40 = vector.shape_cast %39 : vector<2x4x4x4xf32> to vector<32x4xf32>
    %c0_68 = arith.constant 0 : index
    %c36 = arith.constant 36 : index
    %41 = vector.load %arg6[%c0_68, %c36] : memref<32x128xf32, #tpu.memory_space<vmem>>, vector<32x4xf32>
    tpu.vector_store %arg6[%c0_68, %c36], %40 {strides = array<i32>} : memref<32x128xf32, #tpu.memory_space<vmem>>, vector<32x4xf32>,
    %c0_69 = arith.constant 0 : index
    %c0_70 = arith.constant 0 : index
    %c1_71 = arith.constant 1 : index
    %c0_72 = arith.constant 0 : index
    %c1_73 = arith.constant 1 : index
    %c0_74 = arith.constant 0 : index
    %42 = tpu.strided_load %arg2[%c0_69, %c0_70, %c1_71, %c0_72, %c1_73, %c0_74] {strides = array<i32: 1, 1, 2, 2, 2, 1>} : memref<1x1x5x10x10x4xf32, #tpu.memory_space<vmem>>, vector<1x1x2x4x4x4xf32>
    %43 = vector.shape_cast %42 : vector<1x1x2x4x4x4xf32> to vector<2x4x4x4xf32>
    %44 = vector.shape_cast %43 : vector<2x4x4x4xf32> to vector<32x4xf32>
    %c0_75 = arith.constant 0 : index
    %c40 = arith.constant 40 : index
    %45 = vector.load %arg6[%c0_75, %c40] : memref<32x128xf32, #tpu.memory_space<vmem>>, vector<32x4xf32>
    tpu.vector_store %arg6[%c0_75, %c40], %44 {strides = array<i32>} : memref<32x128xf32, #tpu.memory_space<vmem>>, vector<32x4xf32>,
    %c0_76 = arith.constant 0 : index
    %c0_77 = arith.constant 0 : index
    %c1_78 = arith.constant 1 : index
    %c0_79 = arith.constant 0 : index
    %c2_80 = arith.constant 2 : index
    %c0_81 = arith.constant 0 : index
    %46 = tpu.strided_load %arg2[%c0_76, %c0_77, %c1_78, %c0_79, %c2_80, %c0_81] {strides = array<i32: 1, 1, 2, 2, 2, 1>} : memref<1x1x5x10x10x4xf32, #tpu.memory_space<vmem>>, vector<1x1x2x4x4x4xf32>
    %47 = vector.shape_cast %46 : vector<1x1x2x4x4x4xf32> to vector<2x4x4x4xf32>
    %48 = vector.shape_cast %47 : vector<2x4x4x4xf32> to vector<32x4xf32>
    %c0_82 = arith.constant 0 : index
    %c44 = arith.constant 44 : index
    %49 = vector.load %arg6[%c0_82, %c44] : memref<32x128xf32, #tpu.memory_space<vmem>>, vector<32x4xf32>
    tpu.vector_store %arg6[%c0_82, %c44], %48 {strides = array<i32>} : memref<32x128xf32, #tpu.memory_space<vmem>>, vector<32x4xf32>,
    %c0_83 = arith.constant 0 : index
    %c0_84 = arith.constant 0 : index
    %c1_85 = arith.constant 1 : index
    %c1_86 = arith.constant 1 : index
    %c0_87 = arith.constant 0 : index
    %c0_88 = arith.constant 0 : index
    %50 = tpu.strided_load %arg2[%c0_83, %c0_84, %c1_85, %c1_86, %c0_87, %c0_88] {strides = array<i32: 1, 1, 2, 2, 2, 1>} : memref<1x1x5x10x10x4xf32, #tpu.memory_space<vmem>>, vector<1x1x2x4x4x4xf32>
    %51 = vector.shape_cast %50 : vector<1x1x2x4x4x4xf32> to vector<2x4x4x4xf32>
    %52 = vector.shape_cast %51 : vector<2x4x4x4xf32> to vector<32x4xf32>
    %c0_89 = arith.constant 0 : index
    %c48 = arith.constant 48 : index
    %53 = vector.load %arg6[%c0_89, %c48] : memref<32x128xf32, #tpu.memory_space<vmem>>, vector<32x4xf32>
    tpu.vector_store %arg6[%c0_89, %c48], %52 {strides = array<i32>} : memref<32x128xf32, #tpu.memory_space<vmem>>, vector<32x4xf32>,
    %c0_90 = arith.constant 0 : index
    %c0_91 = arith.constant 0 : index
    %c1_92 = arith.constant 1 : index
    %c1_93 = arith.constant 1 : index
    %c1_94 = arith.constant 1 : index
    %c0_95 = arith.constant 0 : index
    %54 = tpu.strided_load %arg2[%c0_90, %c0_91, %c1_92, %c1_93, %c1_94, %c0_95] {strides = array<i32: 1, 1, 2, 2, 2, 1>} : memref<1x1x5x10x10x4xf32, #tpu.memory_space<vmem>>, vector<1x1x2x4x4x4xf32>
    %55 = vector.shape_cast %54 : vector<1x1x2x4x4x4xf32> to vector<2x4x4x4xf32>
    %56 = vector.shape_cast %55 : vector<2x4x4x4xf32> to vector<32x4xf32>
    %c0_96 = arith.constant 0 : index
    %c52 = arith.constant 52 : index
    %57 = vector.load %arg6[%c0_96, %c52] : memref<32x128xf32, #tpu.memory_space<vmem>>, vector<32x4xf32>
    tpu.vector_store %arg6[%c0_96, %c52], %56 {strides = array<i32>} : memref<32x128xf32, #tpu.memory_space<vmem>>, vector<32x4xf32>,
    %c0_97 = arith.constant 0 : index
    %c0_98 = arith.constant 0 : index
    %c1_99 = arith.constant 1 : index
    %c1_100 = arith.constant 1 : index
    %c2_101 = arith.constant 2 : index
    %c0_102 = arith.constant 0 : index
    %58 = tpu.strided_load %arg2[%c0_97, %c0_98, %c1_99, %c1_100, %c2_101, %c0_102] {strides = array<i32: 1, 1, 2, 2, 2, 1>} : memref<1x1x5x10x10x4xf32, #tpu.memory_space<vmem>>, vector<1x1x2x4x4x4xf32>
    %59 = vector.shape_cast %58 : vector<1x1x2x4x4x4xf32> to vector<2x4x4x4xf32>
    %60 = vector.shape_cast %59 : vector<2x4x4x4xf32> to vector<32x4xf32>
    %c0_103 = arith.constant 0 : index
    %c56 = arith.constant 56 : index
    %61 = vector.load %arg6[%c0_103, %c56] : memref<32x128xf32, #tpu.memory_space<vmem>>, vector<32x4xf32>
    tpu.vector_store %arg6[%c0_103, %c56], %60 {strides = array<i32>} : memref<32x128xf32, #tpu.memory_space<vmem>>, vector<32x4xf32>,
    %c0_104 = arith.constant 0 : index
    %c0_105 = arith.constant 0 : index
    %c1_106 = arith.constant 1 : index
    %c2_107 = arith.constant 2 : index
    %c0_108 = arith.constant 0 : index
    %c0_109 = arith.constant 0 : index
    %62 = tpu.strided_load %arg2[%c0_104, %c0_105, %c1_106, %c2_107, %c0_108, %c0_109] {strides = array<i32: 1, 1, 2, 2, 2, 1>} : memref<1x1x5x10x10x4xf32, #tpu.memory_space<vmem>>, vector<1x1x2x4x4x4xf32>
    %63 = vector.shape_cast %62 : vector<1x1x2x4x4x4xf32> to vector<2x4x4x4xf32>
    %64 = vector.shape_cast %63 : vector<2x4x4x4xf32> to vector<32x4xf32>
    %c0_110 = arith.constant 0 : index
    %c60 = arith.constant 60 : index
    %65 = vector.load %arg6[%c0_110, %c60] : memref<32x128xf32, #tpu.memory_space<vmem>>, vector<32x4xf32>
    tpu.vector_store %arg6[%c0_110, %c60], %64 {strides = array<i32>} : memref<32x128xf32, #tpu.memory_space<vmem>>, vector<32x4xf32>,
    %c0_111 = arith.constant 0 : index
    %c0_112 = arith.constant 0 : index
    %c1_113 = arith.constant 1 : index
    %c2_114 = arith.constant 2 : index
    %c1_115 = arith.constant 1 : index
    %c0_116 = arith.constant 0 : index
    %66 = tpu.strided_load %arg2[%c0_111, %c0_112, %c1_113, %c2_114, %c1_115, %c0_116] {strides = array<i32: 1, 1, 2, 2, 2, 1>} : memref<1x1x5x10x10x4xf32, #tpu.memory_space<vmem>>, vector<1x1x2x4x4x4xf32>
    %67 = vector.shape_cast %66 : vector<1x1x2x4x4x4xf32> to vector<2x4x4x4xf32>
    %68 = vector.shape_cast %67 : vector<2x4x4x4xf32> to vector<32x4xf32>
    %c0_117 = arith.constant 0 : index
    %c64 = arith.constant 64 : index
    %69 = vector.load %arg6[%c0_117, %c64] : memref<32x128xf32, #tpu.memory_space<vmem>>, vector<32x4xf32>
    tpu.vector_store %arg6[%c0_117, %c64], %68 {strides = array<i32>} : memref<32x128xf32, #tpu.memory_space<vmem>>, vector<32x4xf32>,
    %c0_118 = arith.constant 0 : index
    %c0_119 = arith.constant 0 : index
    %c1_120 = arith.constant 1 : index
    %c2_121 = arith.constant 2 : index
    %c2_122 = arith.constant 2 : index
    %c0_123 = arith.constant 0 : index
    %70 = tpu.strided_load %arg2[%c0_118, %c0_119, %c1_120, %c2_121, %c2_122, %c0_123] {strides = array<i32: 1, 1, 2, 2, 2, 1>} : memref<1x1x5x10x10x4xf32, #tpu.memory_space<vmem>>, vector<1x1x2x4x4x4xf32>
    %71 = vector.shape_cast %70 : vector<1x1x2x4x4x4xf32> to vector<2x4x4x4xf32>
    %72 = vector.shape_cast %71 : vector<2x4x4x4xf32> to vector<32x4xf32>
    %c0_124 = arith.constant 0 : index
    %c68 = arith.constant 68 : index
    %73 = vector.load %arg6[%c0_124, %c68] : memref<32x128xf32, #tpu.memory_space<vmem>>, vector<32x4xf32>
    tpu.vector_store %arg6[%c0_124, %c68], %72 {strides = array<i32>} : memref<32x128xf32, #tpu.memory_space<vmem>>, vector<32x4xf32>,
    %c0_125 = arith.constant 0 : index
    %c0_126 = arith.constant 0 : index
    %c2_127 = arith.constant 2 : index
    %c0_128 = arith.constant 0 : index
    %c0_129 = arith.constant 0 : index
    %c0_130 = arith.constant 0 : index
    %74 = tpu.strided_load %arg2[%c0_125, %c0_126, %c2_127, %c0_128, %c0_129, %c0_130] {strides = array<i32: 1, 1, 2, 2, 2, 1>} : memref<1x1x5x10x10x4xf32, #tpu.memory_space<vmem>>, vector<1x1x2x4x4x4xf32>
    %75 = vector.shape_cast %74 : vector<1x1x2x4x4x4xf32> to vector<2x4x4x4xf32>
    %76 = vector.shape_cast %75 : vector<2x4x4x4xf32> to vector<32x4xf32>
    %c0_131 = arith.constant 0 : index
    %c72 = arith.constant 72 : index
    %77 = vector.load %arg6[%c0_131, %c72] : memref<32x128xf32, #tpu.memory_space<vmem>>, vector<32x4xf32>
    tpu.vector_store %arg6[%c0_131, %c72], %76 {strides = array<i32>} : memref<32x128xf32, #tpu.memory_space<vmem>>, vector<32x4xf32>,
    %c0_132 = arith.constant 0 : index
    %c0_133 = arith.constant 0 : index
    %c2_134 = arith.constant 2 : index
    %c0_135 = arith.constant 0 : index
    %c1_136 = arith.constant 1 : index
    %c0_137 = arith.constant 0 : index
    %78 = tpu.strided_load %arg2[%c0_132, %c0_133, %c2_134, %c0_135, %c1_136, %c0_137] {strides = array<i32: 1, 1, 2, 2, 2, 1>} : memref<1x1x5x10x10x4xf32, #tpu.memory_space<vmem>>, vector<1x1x2x4x4x4xf32>
    %79 = vector.shape_cast %78 : vector<1x1x2x4x4x4xf32> to vector<2x4x4x4xf32>
    %80 = vector.shape_cast %79 : vector<2x4x4x4xf32> to vector<32x4xf32>
    %c0_138 = arith.constant 0 : index
    %c76 = arith.constant 76 : index
    %81 = vector.load %arg6[%c0_138, %c76] : memref<32x128xf32, #tpu.memory_space<vmem>>, vector<32x4xf32>
    tpu.vector_store %arg6[%c0_138, %c76], %80 {strides = array<i32>} : memref<32x128xf32, #tpu.memory_space<vmem>>, vector<32x4xf32>,
    %c0_139 = arith.constant 0 : index
    %c0_140 = arith.constant 0 : index
    %c2_141 = arith.constant 2 : index
    %c0_142 = arith.constant 0 : index
    %c2_143 = arith.constant 2 : index
    %c0_144 = arith.constant 0 : index
    %82 = tpu.strided_load %arg2[%c0_139, %c0_140, %c2_141, %c0_142, %c2_143, %c0_144] {strides = array<i32: 1, 1, 2, 2, 2, 1>} : memref<1x1x5x10x10x4xf32, #tpu.memory_space<vmem>>, vector<1x1x2x4x4x4xf32>
    %83 = vector.shape_cast %82 : vector<1x1x2x4x4x4xf32> to vector<2x4x4x4xf32>
    %84 = vector.shape_cast %83 : vector<2x4x4x4xf32> to vector<32x4xf32>
    %c0_145 = arith.constant 0 : index
    %c80 = arith.constant 80 : index
    %85 = vector.load %arg6[%c0_145, %c80] : memref<32x128xf32, #tpu.memory_space<vmem>>, vector<32x4xf32>
    tpu.vector_store %arg6[%c0_145, %c80], %84 {strides = array<i32>} : memref<32x128xf32, #tpu.memory_space<vmem>>, vector<32x4xf32>,
    %c0_146 = arith.constant 0 : index
    %c0_147 = arith.constant 0 : index
    %c2_148 = arith.constant 2 : index
    %c1_149 = arith.constant 1 : index
    %c0_150 = arith.constant 0 : index
    %c0_151 = arith.constant 0 : index
    %86 = tpu.strided_load %arg2[%c0_146, %c0_147, %c2_148, %c1_149, %c0_150, %c0_151] {strides = array<i32: 1, 1, 2, 2, 2, 1>} : memref<1x1x5x10x10x4xf32, #tpu.memory_space<vmem>>, vector<1x1x2x4x4x4xf32>
    %87 = vector.shape_cast %86 : vector<1x1x2x4x4x4xf32> to vector<2x4x4x4xf32>
    %88 = vector.shape_cast %87 : vector<2x4x4x4xf32> to vector<32x4xf32>
    %c0_152 = arith.constant 0 : index
    %c84 = arith.constant 84 : index
    %89 = vector.load %arg6[%c0_152, %c84] : memref<32x128xf32, #tpu.memory_space<vmem>>, vector<32x4xf32>
    tpu.vector_store %arg6[%c0_152, %c84], %88 {strides = array<i32>} : memref<32x128xf32, #tpu.memory_space<vmem>>, vector<32x4xf32>,
    %c0_153 = arith.constant 0 : index
    %c0_154 = arith.constant 0 : index
    %c2_155 = arith.constant 2 : index
    %c1_156 = arith.constant 1 : index
    %c1_157 = arith.constant 1 : index
    %c0_158 = arith.constant 0 : index
    %90 = tpu.strided_load %arg2[%c0_153, %c0_154, %c2_155, %c1_156, %c1_157, %c0_158] {strides = array<i32: 1, 1, 2, 2, 2, 1>} : memref<1x1x5x10x10x4xf32, #tpu.memory_space<vmem>>, vector<1x1x2x4x4x4xf32>
    %91 = vector.shape_cast %90 : vector<1x1x2x4x4x4xf32> to vector<2x4x4x4xf32>
    %92 = vector.shape_cast %91 : vector<2x4x4x4xf32> to vector<32x4xf32>
    %c0_159 = arith.constant 0 : index
    %c88 = arith.constant 88 : index
    %93 = vector.load %arg6[%c0_159, %c88] : memref<32x128xf32, #tpu.memory_space<vmem>>, vector<32x4xf32>
    tpu.vector_store %arg6[%c0_159, %c88], %92 {strides = array<i32>} : memref<32x128xf32, #tpu.memory_space<vmem>>, vector<32x4xf32>,
    %c0_160 = arith.constant 0 : index
    %c0_161 = arith.constant 0 : index
    %c2_162 = arith.constant 2 : index
    %c1_163 = arith.constant 1 : index
    %c2_164 = arith.constant 2 : index
    %c0_165 = arith.constant 0 : index
    %94 = tpu.strided_load %arg2[%c0_160, %c0_161, %c2_162, %c1_163, %c2_164, %c0_165] {strides = array<i32: 1, 1, 2, 2, 2, 1>} : memref<1x1x5x10x10x4xf32, #tpu.memory_space<vmem>>, vector<1x1x2x4x4x4xf32>
    %95 = vector.shape_cast %94 : vector<1x1x2x4x4x4xf32> to vector<2x4x4x4xf32>
    %96 = vector.shape_cast %95 : vector<2x4x4x4xf32> to vector<32x4xf32>
    %c0_166 = arith.constant 0 : index
    %c92 = arith.constant 92 : index
    %97 = vector.load %arg6[%c0_166, %c92] : memref<32x128xf32, #tpu.memory_space<vmem>>, vector<32x4xf32>
    tpu.vector_store %arg6[%c0_166, %c92], %96 {strides = array<i32>} : memref<32x128xf32, #tpu.memory_space<vmem>>, vector<32x4xf32>,
    %c0_167 = arith.constant 0 : index
    %c0_168 = arith.constant 0 : index
    %c2_169 = arith.constant 2 : index
    %c2_170 = arith.constant 2 : index
    %c0_171 = arith.constant 0 : index
    %c0_172 = arith.constant 0 : index
    %98 = tpu.strided_load %arg2[%c0_167, %c0_168, %c2_169, %c2_170, %c0_171, %c0_172] {strides = array<i32: 1, 1, 2, 2, 2, 1>} : memref<1x1x5x10x10x4xf32, #tpu.memory_space<vmem>>, vector<1x1x2x4x4x4xf32>
    %99 = vector.shape_cast %98 : vector<1x1x2x4x4x4xf32> to vector<2x4x4x4xf32>
    %100 = vector.shape_cast %99 : vector<2x4x4x4xf32> to vector<32x4xf32>
    %c0_173 = arith.constant 0 : index
    %c96 = arith.constant 96 : index
    %101 = vector.load %arg6[%c0_173, %c96] : memref<32x128xf32, #tpu.memory_space<vmem>>, vector<32x4xf32>
    tpu.vector_store %arg6[%c0_173, %c96], %100 {strides = array<i32>} : memref<32x128xf32, #tpu.memory_space<vmem>>, vector<32x4xf32>,
    %c0_174 = arith.constant 0 : index
    %c0_175 = arith.constant 0 : index
    %c2_176 = arith.constant 2 : index
    %c2_177 = arith.constant 2 : index
    %c1_178 = arith.constant 1 : index
    %c0_179 = arith.constant 0 : index
    %102 = tpu.strided_load %arg2[%c0_174, %c0_175, %c2_176, %c2_177, %c1_178, %c0_179] {strides = array<i32: 1, 1, 2, 2, 2, 1>} : memref<1x1x5x10x10x4xf32, #tpu.memory_space<vmem>>, vector<1x1x2x4x4x4xf32>
    %103 = vector.shape_cast %102 : vector<1x1x2x4x4x4xf32> to vector<2x4x4x4xf32>
    %104 = vector.shape_cast %103 : vector<2x4x4x4xf32> to vector<32x4xf32>
    %c0_180 = arith.constant 0 : index
    %c100 = arith.constant 100 : index
    %105 = vector.load %arg6[%c0_180, %c100] : memref<32x128xf32, #tpu.memory_space<vmem>>, vector<32x4xf32>
    tpu.vector_store %arg6[%c0_180, %c100], %104 {strides = array<i32>} : memref<32x128xf32, #tpu.memory_space<vmem>>, vector<32x4xf32>,
    %c0_181 = arith.constant 0 : index
    %c0_182 = arith.constant 0 : index
    %c2_183 = arith.constant 2 : index
    %c2_184 = arith.constant 2 : index
    %c2_185 = arith.constant 2 : index
    %c0_186 = arith.constant 0 : index
    %106 = tpu.strided_load %arg2[%c0_181, %c0_182, %c2_183, %c2_184, %c2_185, %c0_186] {strides = array<i32: 1, 1, 2, 2, 2, 1>} : memref<1x1x5x10x10x4xf32, #tpu.memory_space<vmem>>, vector<1x1x2x4x4x4xf32>
    %107 = vector.shape_cast %106 : vector<1x1x2x4x4x4xf32> to vector<2x4x4x4xf32>
    %108 = vector.shape_cast %107 : vector<2x4x4x4xf32> to vector<32x4xf32>
    %c0_187 = arith.constant 0 : index
    %c104 = arith.constant 104 : index
    %109 = vector.load %arg6[%c0_187, %c104] : memref<32x128xf32, #tpu.memory_space<vmem>>, vector<32x4xf32>
    tpu.vector_store %arg6[%c0_187, %c104], %108 {strides = array<i32>} : memref<32x128xf32, #tpu.memory_space<vmem>>, vector<32x4xf32>,
    %c0_188 = arith.constant 0 : index
    %c0_189 = arith.constant 0 : index
    %110 = vector.load %arg6[%c0_188, %c0_189] : memref<32x128xf32, #tpu.memory_space<vmem>>, vector<32x128xf32>
    %c0_190 = arith.constant 0 : index
    %c0_191 = arith.constant 0 : index
    %111 = vector.load %arg3[%c0_190, %c0_191] : memref<128x8xf32, #tpu.memory_space<vmem>>, vector<128x8xf32>
    %cst_192 = arith.constant dense<0.000000e+00> : vector<32x8xf32>
    %112 = tpu.matmul %110, %111, %cst_192 {dimension_numbers = #tpu.dot_dimension_numbers<[1], [0], [0], [1], [0, 0, 1, 1], [], []>} : vector<32x128xf32>, vector<128x8xf32>, vector<32x8xf32> -> vector<32x8xf32>
    %c0_193 = arith.constant 0 : index
    %c0_194 = arith.constant 0 : index
    %113 = vector.load %arg4[%c0_193, %c0_194] : memref<1x8xf32, #tpu.memory_space<vmem>>, vector<1x8xf32>
    %114 = vector.broadcast %113 : vector<1x8xf32> to vector<32x8xf32>
    %115 = arith.addf %112, %114 : vector<32x8xf32>
    %cst_195 = arith.constant 0.000000e+00 : f32
    %116 = vector.broadcast %cst_195 : f32 to vector<32x8xf32>
    %117 = arith.maximumf %115, %116 : vector<32x8xf32>
    %c0_196 = arith.constant 0 : index
    %c0_197 = arith.constant 0 : index
    %c0_198 = arith.constant 0 : index
    %c0_199 = arith.constant 0 : index
    %118 = vector.load %arg5[%c0_196, %c0_197, %c0_198, %c0_199] : memref<1x1x32x8xf32, #tpu.memory_space<vmem>>, vector<1x1x32x8xf32>
    %119 = vector.shape_cast %118 : vector<1x1x32x8xf32> to vector<32x8xf32>
    %120 = vector.shape_cast %117 : vector<32x8xf32> to vector<1x1x32x8xf32>
    tpu.vector_store %arg5[%c0_196, %c0_197, %c0_198, %c0_199], %120 {strides = array<i32>} : memref<1x1x32x8xf32, #tpu.memory_space<vmem>>, vector<1x1x32x8xf32>,
    return
  }
  func.func @transform_0(%arg0: i32, %arg1: i32) -> (i32, i32, i32, i32, i32, i32) {
    %c0_i32 = arith.constant 0 : i32
    %c0_i32_0 = arith.constant 0 : i32
    %c0_i32_1 = arith.constant 0 : i32
    %c0_i32_2 = arith.constant 0 : i32
    %c0_i32_3 = arith.constant 0 : i32
    return %arg0, %arg1, %c0_i32, %c0_i32_0, %c0_i32_1, %c0_i32_2 : i32, i32, i32, i32, i32, i32
  }
  func.func @transform_1(%arg0: i32, %arg1: i32) -> (i32, i32) {
    %c0_i32 = arith.constant 0 : i32
    %c0_i32_0 = arith.constant 0 : i32
    %c0_i32_1 = arith.constant 0 : i32
    return %c0_i32, %c0_i32_0 : i32, i32
  }
  func.func @transform_2(%arg0: i32, %arg1: i32) -> (i32, i32) {
    %c0_i32 = arith.constant 0 : i32
    %c0_i32_0 = arith.constant 0 : i32
    %c0_i32_1 = arith.constant 0 : i32
    return %c0_i32, %c0_i32_0 : i32, i32
  }
  func.func @transform_3(%arg0: i32, %arg1: i32) -> (i32, i32, i32, i32) {
    %c0_i32 = arith.constant 0 : i32
    %c0_i32_0 = arith.constant 0 : i32
    %c0_i32_1 = arith.constant 0 : i32
    return %arg0, %arg1, %c0_i32, %c0_i32_0 : i32, i32, i32, i32
  }
}

</mosaic_0001>

<bundles_post_ra>
// kernel: tpu_custom_call.1
= control target key start
LH: loop header
LB: loop body
LE: loop exit
PB: predicated region body
PF: predicated region fallthrough
CT: control target
= control target key end

     0   :  { %s2307_s12 = smov 0   ;;  %s2309_s13 = smov 0   ;;  %s2683_s0 = inlined_call_operand.vmem [shape: f32[2,2,5,10,10,4], index: 0, kind: input, shape index: {}]   ;;  %s2684_s1 = inlined_call_operand.vmem [shape: f32[128,8], index: 1, kind: input, shape index: {}]   ;;  %s2685_s2 = inlined_call_operand.vmem [shape: f32[1,8], index: 2, kind: input, shape index: {}]   ;;  %s2686_s3 = inlined_call_operand.vmem [shape: f32[2,2,32,8], index: 3, kind: output, shape index: {}]  }
   0x1   :  { %s2311_s14 = smov 0   ;;  %s2313_s15 = smov 0  }
   0x2   :  { %s2315_s16 = smov 0  }
   0x3 LB: > { %s22_s17 = sadd.s32 1, %s2250_s14  ;;  %s25_s18 = sadd.s32 1, %s2254_s15  ;;  %s2258_s16 = sphi %s2315_s16, %s13_s16   ;;  %s2254_s15 = sphi %s2313_s15, %s2690_s15   ;;  %s2250_s14 = sphi %s2311_s14, %s2689_s14   ;;  %s2246_s13 = sphi %s2309_s13, %s2688_s13   ;;  %s2242_s12 = sphi %s2307_s12, %s2687_s12  }
   0x4   : > { %p23_p0 = scmp.ge.s32.totalorder %s22_s17, 2  ;;  %p1822_p1 = scmp.ge.s32.totalorder %s2258_s16, 1 }
   0x5   : > { %p157_p2 = scmp.lt.s32.totalorder %s2258_s16, 5 }
   0x6   : > { %s2692_s17 = smov (%p23_p0, %s22_s17), 0  ;;  %s2694_s18 = smov (!%p23_p0, %s25_s18), %s2254_s15 }
   0x7   : > { %p158_p3 = pnand %p1822_p1, %p157_p2  ;;  %p27_p4 = scmp.ge.s32.totalorder %s2694_s18, 2 }
   0x8   : > { %p189_p5 = scmp.lt.s32.totalorder (!%p158_p3), %s2246_s13, 1  ;;  %p191_p6 = scmp.lt.s32.totalorder (!%p158_p3), %s2242_s12, 1  ;;  %vm207_vm0 = vcmask (!%p158_p3), 1048416   ;;  %v2260_v0 = vmov (!%p158_p3), 0.0   ;;  %vm243_vm1 = vcmask (!%p158_p3), 31744   ;;  %vm288_vm2 = vcmask (!%p158_p3), 64544  }
   0x9   : > { %s2696_s18 = smov (%p27_p4, %s2694_s18), 0  ;;  %161 = sbr.rel (%p158_p3) target bundleno = 574 (0x23e), region = 32 }
   0xa   : > { %209 = vst.msk [vmem:[#allocation2 + $0x8] sm:$0xff] (!%p158_p3), %vm207_vm0, %v2260_v0  ;;  %208 = vst.msk [vmem:[#allocation2] sm:$0xff] (!%p158_p3), %vm207_vm0, %v2260_v0  ;;  %s2261_s26 = smov (!%p158_p3), 4   ;;  %s2262_s27 = smov (!%p158_p3), 8   ;;  %vm333_vm3 = vcmask (!%p158_p3), 97344   ;;  %vm378_vm4 = vcmask (!%p158_p3), 130144  }
   0xb   : > { %210 = vst.msk [vmem:[#allocation2 + $0x10] sm:$0xff] (!%p158_p3), %vm207_vm0, %v2260_v0  ;;  %211 = vst.msk [vmem:[#allocation2 + $0x18] sm:$0xff] (!%p158_p3), %vm207_vm0, %v2260_v0  ;;  %s2263_s28 = smov (!%p158_p3), 12   ;;  %s2264_s29 = smov (!%p158_p3), 16   ;;  %vm423_vm5 = vcmask (!%p158_p3), 162944   ;;  %vm468_vm6 = vcmask (!%p158_p3), 195744  }
   0xc   : > { %s2265_s30 = smov (!%p158_p3), 20   ;;  %s2266_s4 = smov (!%p158_p3), 24   ;;  %vm513_vm7 = vcmask (!%p158_p3), 228544   ;;  %vm558_vm8 = vcmask (!%p158_p3), 261344   ;;  %vm603_vm9 = vcmask (!%p158_p3), 294144   ;;  %vm648_vm10 = vcmask (!%p158_p3), 326944  }
   0xd   : > { %s2267_s5 = smov (!%p158_p3), 28   ;;  %s2268_s6 = smov (!%p158_p3), 32   ;;  %vm693_vm11 = vcmask (!%p158_p3), 359744   ;;  %vm738_vm12 = vcmask (!%p158_p3), 392544   ;;  %vm783_vm13 = vcmask (!%p158_p3), 425344   ;;  %vm828_vm14 = vcmask (!%p158_p3), 458144  }
   0xe   : > { %s2269_s7 = smov (!%p158_p3), 36   ;;  %s2270_s8 = smov (!%p158_p3), 40   ;;  %vm873_vm15 = vcmask (!%p158_p3), 490944   ;;  %vm918_vm0 = vcmask (!%p158_p3), 523744  }
   0xf   : > { %s2271_s9 = smov (!%p158_p3), 44   ;;  %s2272_s10 = smov (!%p158_p3), 48  }
  0x10   : > { %s2698_s13 = smov (!%p189_p5, %s2246_s13), 1  ;;  %s2700_s12 = smov (!%p191_p6, %s2242_s12), 1 }
  0x11   : > { %s2152_s19 = smul.u32 200, %s2698_s13  ;;  %s2273_s11 = smov 52  }
  0x12   : > { %s2151_s20 = smul.u32 100, %s2700_s12  ;;  %s2278_s23 = smov 72  }
  0x13   : > { %s2279_s24 = smov 76  }
  0x14   : > { %s195_s21 = sadd.s32 %s2152_s19, %s2151_s20  ;;  %s2274_s19 = smov 56  }
  0x15   : > { %s1823_s22 = sshll.u32 %s195_s21, 3  ;;  %s2275_s20 = smov 60  }
  0x16   : > { %s2346_s25 = scalar_lea.vmem %s2683_s0, %s1823_s22  ;;  %s2276_s21 = smov 64  }
  0x17   : > { %v1836_v1 = vld [vmem:[%s2346_s25 + $0x41] ss:$2 sm:$0xf]  ;;  %v1846_v13 = vld [vmem:[%s2346_s25 + $0x142] ss:$2 sm:$0xf] }
  0x18   : > { %v1837_v2 = vld [vmem:[%s2346_s25 + $0x61] ss:$2 sm:$0xf]  ;;  %v1847_v14 = vld [vmem:[%s2346_s25 + $0x162] ss:$2 sm:$0xf] }
  0x19   : > { %v273_v3 = vcombine.low %v1836_v1, %v1837_v2  ;;  %v1834_v4 = vld [vmem:[%s2346_s25 + $0x1] ss:$2 sm:$0xf]  ;;  %v1842_v15 = vld [vmem:[%s2346_s25 + $0x2] ss:$2 sm:$0xf]  ;;  %v319_v17 = vcombine.low %v1846_v13, %v1847_v14 }
  0x1a   : > { %v1835_v5 = vld [vmem:[%s2346_s25 + $0x21] ss:$2 sm:$0xf]  ;;  %v1843_v16 = vld [vmem:[%s2346_s25 + $0x22] ss:$2 sm:$0xf] }
  0x1b   : > { %v272_v6 = vcombine.low %v1834_v4, %v1835_v5  ;;  %v1840_v7 = vld [vmem:[%s2346_s25 + $0x181] ss:$2 sm:$0xf]  ;;  %278 = vrot.lane.b32.xlu1 %v273_v3, %s2261_s26  ;;  %v317_v18 = vcombine.low %v1842_v15, %v1843_v16  ;;  %v1848_v19 = vld [vmem:[%s2346_s25 + $0x182] ss:$2 sm:$0xf] }
  0x1c   : > { %v1841_v8 = vld [vmem:[%s2346_s25 + $0x1a1] ss:$2 sm:$0xf]  ;;  %v1849_v20 = vld [vmem:[%s2346_s25 + $0x1a2] ss:$2 sm:$0xf] }
  0x1d   : > { %v275_v9 = vcombine.low %v1840_v7, %v1841_v8  ;;  %v1838_v10 = vld [vmem:[%s2346_s25 + $0x141] ss:$2 sm:$0xf]  ;;  %276 = vrot.lane.b32.xlu0 %v272_v6, %s2261_s26  ;;  %v1844_v21 = vld [vmem:[%s2346_s25 + $0x42] ss:$2 sm:$0xf]  ;;  %v320_v23 = vcombine.low %v1848_v19, %v1849_v20 }
  0x1e   : > { %v1839_v11 = vld [vmem:[%s2346_s25 + $0x161] ss:$2 sm:$0xf]  ;;  %v1845_v22 = vld [vmem:[%s2346_s25 + $0x62] ss:$2 sm:$0xf] }
  0x1f   : > { %v274_v12 = vcombine.low %v1838_v10, %v1839_v11  ;;  %282 = vrot.lane.b32.xlu1 %v275_v9, %s2261_s26  ;;  %v318_v24 = vcombine.low %v1844_v21, %v1845_v22  ;;  %v1854_v25 = vld [vmem:[%s2346_s25 + $0x150] ss:$2 sm:$0xf]  ;;  %v1862_v37 = vld [vmem:[%s2346_s25 + $0x151] ss:$2 sm:$0xf] }
  0x20   : > { %v1855_v26 = vld [vmem:[%s2346_s25 + $0x170] ss:$2 sm:$0xf]  ;;  %v1863_v38 = vld [vmem:[%s2346_s25 + $0x171] ss:$2 sm:$0xf] }
  0x21   : > { %280 = vrot.lane.b32.xlu0 %v274_v12, %s2261_s26  ;;  %v1850_v27 = vld [vmem:[%s2346_s25 + $0x10] ss:$2 sm:$0xf]  ;;  %v364_v29 = vcombine.low %v1854_v25, %v1855_v26  ;;  %v1858_v39 = vld [vmem:[%s2346_s25 + $0x11] ss:$2 sm:$0xf]  ;;  %v409_v41 = vcombine.low %v1862_v37, %v1863_v38 }
  0x22   : > { %v1851_v28 = vld [vmem:[%s2346_s25 + $0x30] ss:$2 sm:$0xf]  ;;  %v1859_v40 = vld [vmem:[%s2346_s25 + $0x31] ss:$2 sm:$0xf] }
  0x23   : > { %325 = vrot.lane.b32.xlu1 %v319_v17, %s2262_s27  ;;  %v362_v30 = vcombine.low %v1850_v27, %v1851_v28  ;;  %v1856_v31 = vld [vmem:[%s2346_s25 + $0x190] ss:$2 sm:$0xf]  ;;  %v407_v42 = vcombine.low %v1858_v39, %v1859_v40  ;;  %v1864_v43 = vld [vmem:[%s2346_s25 + $0x191] ss:$2 sm:$0xf] }
  0x24   : > { %v1857_v32 = vld [vmem:[%s2346_s25 + $0x1b0] ss:$2 sm:$0xf]  ;;  %v1865_v44 = vld [vmem:[%s2346_s25 + $0x1b1] ss:$2 sm:$0xf] }
  0x25   : > { %321 = vrot.lane.b32.xlu0 %v317_v18, %s2262_s27  ;;  %v1852_v33 = vld [vmem:[%s2346_s25 + $0x50] ss:$2 sm:$0xf]  ;;  %v365_v35 = vcombine.low %v1856_v31, %v1857_v32  ;;  %v1860_v45 = vld [vmem:[%s2346_s25 + $0x51] ss:$2 sm:$0xf]  ;;  %v410_v47 = vcombine.low %v1864_v43, %v1865_v44 }
  0x26   : > { %v1853_v34 = vld [vmem:[%s2346_s25 + $0x70] ss:$2 sm:$0xf]  ;;  %v1861_v46 = vld [vmem:[%s2346_s25 + $0x71] ss:$2 sm:$0xf] }
  0x27   : > { %327 = vrot.lane.b32.xlu1 %v320_v23, %s2262_s27  ;;  %v363_v36 = vcombine.low %v1852_v33, %v1853_v34  ;;  %v408_v48 = vcombine.low %v1860_v45, %v1861_v46  ;;  %v1870_v49 = vld [vmem:[%s2346_s25 + $0x152] ss:$2 sm:$0xf]  ;;  %v1878_v61 = vld [vmem:[%s2346_s25 + $0x160] ss:$2 sm:$0xf] }
  0x28   : > { %v1871_v50 = vld [vmem:[%s2346_s25 + $0x172] ss:$2 sm:$0xf]  ;;  %v1879_v62 = vld [vmem:[%s2346_s25 + $0x180] ss:$2 sm:$0xf] }
  0x29   : > { %323 = vrot.lane.b32.xlu0 %v318_v24, %s2262_s27  ;;  %v1866_v51 = vld [vmem:[%s2346_s25 + $0x12] ss:$2 sm:$0xf]  ;;  %v454_v53 = vcombine.low %v1870_v49, %v1871_v50  ;;  %v1874_v63 = vld [vmem:[%s2346_s25 + $0x20] ss:$2 sm:$0xf]  ;;  %v499_v1 = vcombine.low %v1878_v61, %v1879_v62 }
  0x2a   : > { %v1867_v52 = vld [vmem:[%s2346_s25 + $0x32] ss:$2 sm:$0xf]  ;;  %v1875_v0 = vld [vmem:[%s2346_s25 + $0x40] ss:$2 sm:$0xf] }
  0x2b   : > { %370 = vrot.lane.b32.xlu1 %v364_v29, %s2263_s28  ;;  %v452_v54 = vcombine.low %v1866_v51, %v1867_v52  ;;  %v1872_v55 = vld [vmem:[%s2346_s25 + $0x192] ss:$2 sm:$0xf]  ;;  %v497_v2 = vcombine.low %v1874_v63, %v1875_v0  ;;  %v1880_v3 = vld [vmem:[%s2346_s25 + $0x1a0] ss:$2 sm:$0xf] }
  0x2c   : > { %v1873_v56 = vld [vmem:[%s2346_s25 + $0x1b2] ss:$2 sm:$0xf]  ;;  %v1881_v4 = vld [vmem:[%s2346_s25 + $0x1c0] ss:$2 sm:$0xf] }
  0x2d   : > { %366 = vrot.lane.b32.xlu0 %v362_v30, %s2263_s28  ;;  %v1868_v57 = vld [vmem:[%s2346_s25 + $0x52] ss:$2 sm:$0xf]  ;;  %v455_v59 = vcombine.low %v1872_v55, %v1873_v56  ;;  %v1876_v5 = vld [vmem:[%s2346_s25 + $0x60] ss:$2 sm:$0xf]  ;;  %v500_v7 = vcombine.low %v1880_v3, %v1881_v4 }
  0x2e   : > { %v1869_v58 = vld [vmem:[%s2346_s25 + $0x72] ss:$2 sm:$0xf]  ;;  %v1877_v6 = vld [vmem:[%s2346_s25 + $0x80] ss:$2 sm:$0xf] }
  0x2f   : > { %372 = vrot.lane.b32.xlu1 %v365_v35, %s2263_s28  ;;  %v453_v60 = vcombine.low %v1868_v57, %v1869_v58  ;;  %v498_v8 = vcombine.low %v1876_v5, %v1877_v6  ;;  %v1886_v9 = vld [vmem:[%s2346_s25 + $0x161] ss:$2 sm:$0xf]  ;;  %v1894_v21 = vld [vmem:[%s2346_s25 + $0x162] ss:$2 sm:$0xf] }
  0x30   : > { %v1887_v10 = vld [vmem:[%s2346_s25 + $0x181] ss:$2 sm:$0xf]  ;;  %v1895_v22 = vld [vmem:[%s2346_s25 + $0x182] ss:$2 sm:$0xf] }
  0x31   : > { %368 = vrot.lane.b32.xlu0 %v363_v36, %s2263_s28  ;;  %v1882_v11 = vld [vmem:[%s2346_s25 + $0x21] ss:$2 sm:$0xf]  ;;  %v544_v13 = vcombine.low %v1886_v9, %v1887_v10  ;;  %v1890_v23 = vld [vmem:[%s2346_s25 + $0x22] ss:$2 sm:$0xf]  ;;  %v589_v25 = vcombine.low %v1894_v21, %v1895_v22 }
  0x32   : > { %v1883_v12 = vld [vmem:[%s2346_s25 + $0x41] ss:$2 sm:$0xf]  ;;  %v1891_v24 = vld [vmem:[%s2346_s25 + $0x42] ss:$2 sm:$0xf] }
  0x33   : > { %415 = vrot.lane.b32.xlu1 %v409_v41, %s2264_s29  ;;  %v542_v14 = vcombine.low %v1882_v11, %v1883_v12  ;;  %v1888_v15 = vld [vmem:[%s2346_s25 + $0x1a1] ss:$2 sm:$0xf]  ;;  %v587_v26 = vcombine.low %v1890_v23, %v1891_v24  ;;  %v1896_v27 = vld [vmem:[%s2346_s25 + $0x1a2] ss:$2 sm:$0xf] }
  0x34   : > { %v1889_v16 = vld [vmem:[%s2346_s25 + $0x1c1] ss:$2 sm:$0xf]  ;;  %v1897_v28 = vld [vmem:[%s2346_s25 + $0x1c2] ss:$2 sm:$0xf] }
  0x35   : > { %411 = vrot.lane.b32.xlu0 %v407_v42, %s2264_s29  ;;  %v1884_v17 = vld [vmem:[%s2346_s25 + $0x61] ss:$2 sm:$0xf]  ;;  %v545_v19 = vcombine.low %v1888_v15, %v1889_v16  ;;  %v1892_v29 = vld [vmem:[%s2346_s25 + $0x62] ss:$2 sm:$0xf]  ;;  %v590_v33 = vcombine.low %v1896_v27, %v1897_v28 }
  0x36   : > { %v1885_v18 = vld [vmem:[%s2346_s25 + $0x81] ss:$2 sm:$0xf]  ;;  %v1893_v30 = vld [vmem:[%s2346_s25 + $0x82] ss:$2 sm:$0xf] }
  0x37   : > { %417 = vrot.lane.b32.xlu1 %v410_v47, %s2264_s29  ;;  %v543_v20 = vcombine.low %v1884_v17, %v1885_v18  ;;  %v1902_v31 = vld [vmem:[%s2346_s25 + $0x1e0] ss:$2 sm:$0xf]  ;;  %v588_v36 = vcombine.low %v1892_v29, %v1893_v30  ;;  %v1910_v57 = vld [vmem:[%s2346_s25 + $0x1e1] ss:$2 sm:$0xf] }
  0x38   : > { %v1903_v32 = vld [vmem:[%s2346_s25 + $0x200] ss:$2 sm:$0xf]  ;;  %v1911_v58 = vld [vmem:[%s2346_s25 + $0x201] ss:$2 sm:$0xf] }
  0x39   : > { %413 = vrot.lane.b32.xlu0 %v408_v48, %s2264_s29  ;;  %v1898_v34 = vld [vmem:[%s2346_s25 + $0xa0] ss:$2 sm:$0xf]  ;;  %v634_v45 = vcombine.low %v1902_v31, %v1903_v32  ;;  %v679_v61 = vcombine.low %v1910_v57, %v1911_v58  ;;  %v1912_v63 = vld [vmem:[%s2346_s25 + $0x221] ss:$2 sm:$0xf] }
  0x3a   : > { %v1828_v35 = vld [vmem:[%s2346_s25 + $0x40] ss:$2 sm:$0xf]  ;;  %v1913_v0 = vld [vmem:[%s2346_s25 + $0x241] ss:$2 sm:$0xf] }
  0x3b   : > { %460 = vrot.lane.b32.xlu1 %v454_v53, %s2265_s30  ;;  %v1829_v37 = vld [vmem:[%s2346_s25 + $0x60] ss:$2 sm:$0xf]  ;;  %v680_v3 = vcombine.low %v1912_v63, %v1913_v0  ;;  %v1926_v17 = vld [vmem:[%s2346_s25 + $0x1f0] ss:$2 sm:$0xf] }
  0x3c   : > { %v212_v38 = vld [vmem:[%s2346_s25] ss:$2 sm:$0xf]  ;;  %v236_v40 = vcombine.low %v1828_v35, %v1829_v37  ;;  %v1927_v18 = vld [vmem:[%s2346_s25 + $0x210] ss:$2 sm:$0xf] }
  0x3d   : > { %456 = vrot.lane.b32.xlu0 %v452_v54, %s2265_s30  ;;  %v1899_v39 = vld [vmem:[%s2346_s25 + $0xc0] ss:$2 sm:$0xf]  ;;  %v769_v21 = vcombine.low %v1926_v17, %v1927_v18  ;;  %v1928_v23 = vld [vmem:[%s2346_s25 + $0x230] ss:$2 sm:$0xf] }
  0x3e   : > { %v1827_v41 = vld [vmem:[%s2346_s25 + $0x20] ss:$2 sm:$0xf]  ;;  %245 = vst.msk [vmem:[#allocation2 + $0x8] sm:$0xff] %vm243_vm1, %v236_v40  ;;  %v632_v48 = vcombine.low %v1898_v34, %v1899_v39  ;;  %s2277_s22 = smov 68   ;;  %s2280_s26 = smov 80  }
  0x3f   : > { %462 = vrot.lane.b32.xlu1 %v455_v59, %s2265_s30  ;;  %v1904_v42 = vld [vmem:[%s2346_s25 + $0x220] ss:$2 sm:$0xf]  ;;  %v235_v44 = vcombine.low %v212_v38, %v1827_v41  ;;  %v1906_v59 = vld [vmem:[%s2346_s25 + $0xa1] ss:$2 sm:$0xf] }
  0x40   : > { %v1905_v43 = vld [vmem:[%s2346_s25 + $0x240] ss:$2 sm:$0xf]  ;;  %v1929_v24 = vld [vmem:[%s2346_s25 + $0x250] ss:$2 sm:$0xf] }
  0x41   : > { %458 = vrot.lane.b32.xlu0 %v453_v60, %s2265_s30  ;;  %v1900_v46 = vld [vmem:[%s2346_s25 + $0xe0] ss:$2 sm:$0xf]  ;;  %244 = vst.msk [vmem:[#allocation2] sm:$0xff] %vm243_vm1, %v235_v44  ;;  %v635_v55 = vcombine.low %v1904_v42, %v1905_v43  ;;  %v770_v27 = vcombine.low %v1928_v23, %v1929_v24  ;;  %s2281_s27 = smov 84  }
  0x42   : > { %v1832_v47 = vld [vmem:[%s2346_s25 + $0x180] ss:$2 sm:$0xf]  ;;  %v1907_v60 = vld [vmem:[%s2346_s25 + $0xc1] ss:$2 sm:$0xf] }
  0x43   : > { %505 = vrot.lane.b32.xlu1 %v499_v1, %s2266_s4  ;;  %v1833_v49 = vld [vmem:[%s2346_s25 + $0x1a0] ss:$2 sm:$0xf]  ;;  %v677_v62 = vcombine.low %v1906_v59, %v1907_v60  ;;  %v1908_v1 = vld [vmem:[%s2346_s25 + $0xe1] ss:$2 sm:$0xf] }
  0x44   : > { %v1830_v50 = vld [vmem:[%s2346_s25 + $0x140] ss:$2 sm:$0xf]  ;;  %v238_v52 = vcombine.low %v1832_v47, %v1833_v49  ;;  %v1934_v29 = vld [vmem:[%s2346_s25 + $0x1f1] ss:$2 sm:$0xf] }
  0x45   : > { %501 = vrot.lane.b32.xlu0 %v497_v2, %s2266_s4  ;;  %v1901_v51 = vld [vmem:[%s2346_s25 + $0x100] ss:$2 sm:$0xf]  ;;  %v1909_v2 = vld [vmem:[%s2346_s25 + $0x101] ss:$2 sm:$0xf] }
  0x46   : > { %v1831_v53 = vld [vmem:[%s2346_s25 + $0x160] ss:$2 sm:$0xf]  ;;  %247 = vst.msk [vmem:[#allocation2 + $0x18] sm:$0xff] %vm243_vm1, %v238_v52  ;;  %v633_v56 = vcombine.low %v1900_v46, %v1901_v51  ;;  %v678_v4 = vcombine.low %v1908_v1, %v1909_v2 }
  0x47   : > { %507 = vrot.lane.b32.xlu1 %v500_v7, %s2266_s4  ;;  %v237_v54 = vcombine.low %v1830_v50, %v1831_v53  ;;  %v1918_v5 = vld [vmem:[%s2346_s25 + $0x1e2] ss:$2 sm:$0xf]  ;;  %v1935_v30 = vld [vmem:[%s2346_s25 + $0x211] ss:$2 sm:$0xf] }
  0x48   : > { %v1919_v6 = vld [vmem:[%s2346_s25 + $0x202] ss:$2 sm:$0xf]  ;;  %v1930_v31 = vld [vmem:[%s2346_s25 + $0xb1] ss:$2 sm:$0xf] }
  0x49   : > { %503 = vrot.lane.b32.xlu0 %v498_v8, %s2266_s4  ;;  %246 = vst.msk [vmem:[#allocation2 + $0x10] sm:$0xff] %vm243_vm1, %v237_v54  ;;  %v1914_v7 = vld [vmem:[%s2346_s25 + $0xa2] ss:$2 sm:$0xf]  ;;  %v724_v9 = vcombine.low %v1918_v5, %v1919_v6  ;;  %s2284_s4 = smov 96   ;;  %vm963_vm1 = vcmask 556544  }
  0x4a   : > { %v1915_v8 = vld [vmem:[%s2346_s25 + $0xc2] ss:$2 sm:$0xf]  ;;  %v1931_v32 = vld [vmem:[%s2346_s25 + $0xd1] ss:$2 sm:$0xf] }
  0x4b   : > { %550 = vrot.lane.b32.xlu1 %v544_v13, %s2267_s5  ;;  %v722_v10 = vcombine.low %v1914_v7, %v1915_v8  ;;  %v1920_v11 = vld [vmem:[%s2346_s25 + $0x222] ss:$2 sm:$0xf]  ;;  %v812_v34 = vcombine.low %v1930_v31, %v1931_v32  ;;  %v1936_v35 = vld [vmem:[%s2346_s25 + $0x231] ss:$2 sm:$0xf] }
  0x4c   : > { %v1921_v12 = vld [vmem:[%s2346_s25 + $0x242] ss:$2 sm:$0xf]  ;;  %v1932_v37 = vld [vmem:[%s2346_s25 + $0xf1] ss:$2 sm:$0xf] }
  0x4d   : > { %546 = vrot.lane.b32.xlu0 %v542_v14, %s2267_s5  ;;  %v1916_v13 = vld [vmem:[%s2346_s25 + $0xe2] ss:$2 sm:$0xf]  ;;  %v725_v15 = vcombine.low %v1920_v11, %v1921_v12  ;;  %v1933_v38 = vld [vmem:[%s2346_s25 + $0x111] ss:$2 sm:$0xf] }
  0x4e   : > { %v1917_v14 = vld [vmem:[%s2346_s25 + $0x102] ss:$2 sm:$0xf]  ;;  %v813_v40 = vcombine.low %v1932_v37, %v1933_v38  ;;  %v1942_v41 = vld [vmem:[%s2346_s25 + $0x1f2] ss:$2 sm:$0xf] }
  0x4f   : > { %552 = vrot.lane.b32.xlu1 %v545_v19, %s2267_s5  ;;  %v723_v16 = vcombine.low %v1916_v13, %v1917_v14  ;;  %v1922_v19 = vld [vmem:[%s2346_s25 + $0xb0] ss:$2 sm:$0xf]  ;;  %v1950_v53 = vld [vmem:[%s2346_s25 + $0x200] ss:$2 sm:$0xf] }
  0x50   : > { %v1943_v42 = vld [vmem:[%s2346_s25 + $0x212] ss:$2 sm:$0xf]  ;;  %v1951_v54 = vld [vmem:[%s2346_s25 + $0x220] ss:$2 sm:$0xf] }
  0x51   : > { %548 = vrot.lane.b32.xlu0 %v543_v20, %s2267_s5  ;;  %v1923_v20 = vld [vmem:[%s2346_s25 + $0xd0] ss:$2 sm:$0xf]  ;;  %v904_v57 = vcombine.low %v1950_v53, %v1951_v54  ;;  %v1952_v59 = vld [vmem:[%s2346_s25 + $0x240] ss:$2 sm:$0xf] }
  0x52   : > { %v767_v22 = vcombine.low %v1922_v19, %v1923_v20  ;;  %v1938_v43 = vld [vmem:[%s2346_s25 + $0xb2] ss:$2 sm:$0xf]  ;;  %v1953_v60 = vld [vmem:[%s2346_s25 + $0x260] ss:$2 sm:$0xf] }
  0x53   : > { %595 = vrot.lane.b32.xlu1 %v589_v25, %s2268_s6  ;;  %v1924_v25 = vld [vmem:[%s2346_s25 + $0xf0] ss:$2 sm:$0xf]  ;;  %v905_v63 = vcombine.low %v1952_v59, %v1953_v60  ;;  %v1958_v1 = vld [vmem:[%s2346_s25 + $0x201] ss:$2 sm:$0xf] }
  0x54   : > { %v1939_v44 = vld [vmem:[%s2346_s25 + $0xd2] ss:$2 sm:$0xf]  ;;  %v1959_v2 = vld [vmem:[%s2346_s25 + $0x221] ss:$2 sm:$0xf] }
  0x55   : > { %591 = vrot.lane.b32.xlu0 %v587_v26, %s2268_s6  ;;  %v1925_v26 = vld [vmem:[%s2346_s25 + $0x110] ss:$2 sm:$0xf]  ;;  %v857_v46 = vcombine.low %v1938_v43, %v1939_v44  ;;  %v1955_v5 = vld [vmem:[%s2346_s25 + $0xe1] ss:$2 sm:$0xf]  ;;  %v949_v7 = vcombine.low %v1958_v1, %v1959_v2 }
  0x56   : > { %v768_v28 = vcombine.low %v1924_v25, %v1925_v26  ;;  %v1944_v47 = vld [vmem:[%s2346_s25 + $0x232] ss:$2 sm:$0xf]  ;;  %v1956_v12 = vld [vmem:[%s2346_s25 + $0x101] ss:$2 sm:$0xf] }
  0x57   : > { %597 = vrot.lane.b32.xlu1 %v590_v33, %s2268_s6  ;;  %v814_v33 = vcombine.low %v1934_v29, %v1935_v30  ;;  %v1940_v49 = vld [vmem:[%s2346_s25 + $0xf2] ss:$2 sm:$0xf]  ;;  %v1957_v13 = vld [vmem:[%s2346_s25 + $0x121] ss:$2 sm:$0xf] }
  0x58   : > { %v1941_v50 = vld [vmem:[%s2346_s25 + $0x112] ss:$2 sm:$0xf]  ;;  %v1966_v17 = vld [vmem:[%s2346_s25 + $0x202] ss:$2 sm:$0xf] }
  0x59   : > { %593 = vrot.lane.b32.xlu0 %v588_v36, %s2268_s6  ;;  %v1937_v36 = vld [vmem:[%s2346_s25 + $0x251] ss:$2 sm:$0xf]  ;;  %v858_v52 = vcombine.low %v1940_v49, %v1941_v50  ;;  %v1967_v18 = vld [vmem:[%s2346_s25 + $0x222] ss:$2 sm:$0xf] }
  0x5a   : > { %v815_v39 = vcombine.low %v1936_v35, %v1937_v36  ;;  %v1962_v20 = vld [vmem:[%s2346_s25 + $0xc2] ss:$2 sm:$0xf]  ;;  %v994_v23 = vcombine.low %v1966_v17, %v1967_v18  ;;  %v1982_v49 = vld [vmem:[%s2346_s25 + $0x281] ss:$2 sm:$0xf] }
  0x5b   : > { %640 = vrot.lane.b32.xlu1 %v634_v45, %s2269_s7  ;;  %v859_v45 = vcombine.low %v1942_v41, %v1943_v42  ;;  %v1968_v25 = vld [vmem:[%s2346_s25 + $0x242] ss:$2 sm:$0xf]  ;;  %v1983_v50 = vld [vmem:[%s2346_s25 + $0x2a1] ss:$2 sm:$0xf] }
  0x5c   : > { %v1969_v26 = vld [vmem:[%s2346_s25 + $0x262] ss:$2 sm:$0xf]  ;;  %v1979_v53 = vld [vmem:[%s2346_s25 + $0x161] ss:$2 sm:$0xf] }
  0x5d   : > { %636 = vrot.lane.b32.xlu0 %v632_v48, %s2269_s7  ;;  %v1945_v48 = vld [vmem:[%s2346_s25 + $0x252] ss:$2 sm:$0xf]  ;;  %v1965_v29 = vld [vmem:[%s2346_s25 + $0x122] ss:$2 sm:$0xf]  ;;  %v995_v31 = vcombine.low %v1968_v25, %v1969_v26 }
  0x5e   : > { %v860_v51 = vcombine.low %v1944_v47, %v1945_v48  ;;  %v1970_v36 = vld [vmem:[%s2346_s25 + $0x140] ss:$2 sm:$0xf]  ;;  %v1980_v60 = vld [vmem:[%s2346_s25 + $0x181] ss:$2 sm:$0xf] }
  0x5f   : > { %642 = vrot.lane.b32.xlu1 %v635_v55, %s2269_s7  ;;  %v1946_v55 = vld [vmem:[%s2346_s25 + $0xc0] ss:$2 sm:$0xf]  ;;  %v1998_v17 = vld [vmem:[%s2346_s25 + $0x290] ss:$2 sm:$0xf] }
  0x60   : > { %v1971_v37 = vld [vmem:[%s2346_s25 + $0x160] ss:$2 sm:$0xf]  ;;  %v1999_v18 = vld [vmem:[%s2346_s25 + $0x2b0] ss:$2 sm:$0xf] }
  0x61   : > { %638 = vrot.lane.b32.xlu0 %v633_v56, %s2269_s7  ;;  %v1947_v56 = vld [vmem:[%s2346_s25 + $0xe0] ss:$2 sm:$0xf]  ;;  %v2000_v25 = vld [vmem:[%s2346_s25 + $0x2d0] ss:$2 sm:$0xf] }
  0x62   : > { %v902_v58 = vcombine.low %v1946_v55, %v1947_v56  ;;  %v1976_v41 = vld [vmem:[%s2346_s25 + $0x2c0] ss:$2 sm:$0xf]  ;;  %v1084_v55 = vcombine.low %v1982_v49, %v1983_v50  ;;  %v2001_v26 = vld [vmem:[%s2346_s25 + $0x2f0] ss:$2 sm:$0xf] }
  0x63   : > { %685 = vrot.lane.b32.xlu1 %v679_v61, %s2270_s8  ;;  %v1948_v61 = vld [vmem:[%s2346_s25 + $0x100] ss:$2 sm:$0xf]  ;;  %s2282_s5 = smov 88  }
  0x64   : > { %v1977_v42 = vld [vmem:[%s2346_s25 + $0x2e0] ss:$2 sm:$0xf] }
  0x65   : > { %681 = vrot.lane.b32.xlu0 %v677_v62, %s2270_s8  ;;  %v1949_v62 = vld [vmem:[%s2346_s25 + $0x120] ss:$2 sm:$0xf]  ;;  %v1040_v47 = vcombine.low %v1976_v41, %v1977_v42  ;;  %v2009_v42 = vld [vmem:[%s2346_s25 + $0x2f1] ss:$2 sm:$0xf] }
  0x66   : > { %v903_v0 = vcombine.low %v1948_v61, %v1949_v62  ;;  %v1972_v44 = vld [vmem:[%s2346_s25 + $0x180] ss:$2 sm:$0xf]  ;;  %v1981_v61 = vld [vmem:[%s2346_s25 + $0x1a1] ss:$2 sm:$0xf] }
  0x67   : > { %687 = vrot.lane.b32.xlu1 %v680_v3, %s2270_s8  ;;  %v1990_v1 = vld [vmem:[%s2346_s25 + $0x282] ss:$2 sm:$0xf] }
  0x68   : > { %v1991_v2 = vld [vmem:[%s2346_s25 + $0x2a2] ss:$2 sm:$0xf] }
  0x69   : > { %683 = vrot.lane.b32.xlu0 %v678_v4, %s2270_s8  ;;  %v1954_v4 = vld [vmem:[%s2346_s25 + $0xc1] ss:$2 sm:$0xf] }
  0x6a   : > { %v947_v8 = vcombine.low %v1954_v4, %v1955_v5  ;;  %v1986_v4 = vld [vmem:[%s2346_s25 + $0x142] ss:$2 sm:$0xf] }
  0x6b   : > { %730 = vrot.lane.b32.xlu1 %v724_v9, %s2271_s9  ;;  %v1960_v9 = vld [vmem:[%s2346_s25 + $0x241] ss:$2 sm:$0xf]  ;;  %v1987_v5 = vld [vmem:[%s2346_s25 + $0x162] ss:$2 sm:$0xf] }
  0x6d   : > { %726 = vrot.lane.b32.xlu0 %v722_v10, %s2271_s9  ;;  %v1961_v10 = vld [vmem:[%s2346_s25 + $0x261] ss:$2 sm:$0xf] }
  0x6f   : > { %732 = vrot.lane.b32.xlu1 %v725_v15, %s2271_s9  ;;  %v950_v15 = vcombine.low %v1960_v9, %v1961_v10  ;;  %v1992_v9 = vld [vmem:[%s2346_s25 + $0x2c2] ss:$2 sm:$0xf] }
  0x70   : > { %v1993_v10 = vld [vmem:[%s2346_s25 + $0x2e2] ss:$2 sm:$0xf] }
  0x71   : > { %728 = vrot.lane.b32.xlu0 %v723_v16, %s2271_s9  ;;  %v948_v16 = vcombine.low %v1956_v12, %v1957_v13  ;;  %v1988_v12 = vld [vmem:[%s2346_s25 + $0x182] ss:$2 sm:$0xf] }
  0x72   : > { %v1989_v13 = vld [vmem:[%s2346_s25 + $0x1a2] ss:$2 sm:$0xf] }
  0x73   : > { %775 = vrot.lane.b32.xlu1 %v769_v21, %s2272_s10  ;;  %v1963_v21 = vld [vmem:[%s2346_s25 + $0xe2] ss:$2 sm:$0xf] }
  0x74   : > { %v992_v24 = vcombine.low %v1962_v20, %v1963_v21  ;;  %v1994_v20 = vld [vmem:[%s2346_s25 + $0x150] ss:$2 sm:$0xf] }
  0x75   : > { %771 = vrot.lane.b32.xlu0 %v767_v22, %s2272_s10  ;;  %v1995_v21 = vld [vmem:[%s2346_s25 + $0x170] ss:$2 sm:$0xf] }
  0x77   : > { %777 = vrot.lane.b32.xlu1 %v770_v27, %s2272_s10 }
  0x79   : > { %773 = vrot.lane.b32.xlu0 %v768_v28, %s2272_s10  ;;  %v1964_v28 = vld [vmem:[%s2346_s25 + $0x102] ss:$2 sm:$0xf] }
  0x7a   : > { %v993_v32 = vcombine.low %v1964_v28, %v1965_v29  ;;  %v1996_v28 = vld [vmem:[%s2346_s25 + $0x190] ss:$2 sm:$0xf] }
  0x7b   : > { %820 = vrot.lane.b32.xlu1 %v814_v33, %s2273_s11  ;;  %v1974_v33 = vld [vmem:[%s2346_s25 + $0x280] ss:$2 sm:$0xf]  ;;  %v1997_v29 = vld [vmem:[%s2346_s25 + $0x1b0] ss:$2 sm:$0xf] }
  0x7d   : > { %816 = vrot.lane.b32.xlu0 %v812_v34, %s2273_s11  ;;  %v1975_v34 = vld [vmem:[%s2346_s25 + $0x2a0] ss:$2 sm:$0xf] }
  0x7f   : > { %822 = vrot.lane.b32.xlu1 %v815_v39, %s2273_s11  ;;  %v1039_v39 = vcombine.low %v1974_v33, %v1975_v34  ;;  %v2006_v33 = vld [vmem:[%s2346_s25 + $0x291] ss:$2 sm:$0xf] }
  0x80   : > { %v2007_v34 = vld [vmem:[%s2346_s25 + $0x2b1] ss:$2 sm:$0xf] }
  0x81   : > { %818 = vrot.lane.b32.xlu0 %v813_v40, %s2273_s11  ;;  %v1037_v40 = vcombine.low %v1970_v36, %v1971_v37  ;;  %v2002_v36 = vld [vmem:[%s2346_s25 + $0x151] ss:$2 sm:$0xf] }
  0x82   : > { %v2003_v37 = vld [vmem:[%s2346_s25 + $0x171] ss:$2 sm:$0xf] }
  0x83   : > { %865 = vrot.lane.b32.xlu1 %v859_v45, %s2274_s19  ;;  %v1973_v45 = vld [vmem:[%s2346_s25 + $0x1a0] ss:$2 sm:$0xf]  ;;  %v1217_v41 = vcombine.low %v2002_v36, %v2003_v37  ;;  %v2026_v37 = vld [vmem:[%s2346_s25 + $0x161] ss:$2 sm:$0xf] }
  0x84   : > { %v1038_v48 = vcombine.low %v1972_v44, %v1973_v45  ;;  %v1423_v44 = vld [vmem:[%s2684_s1 + $0x8] sm:$0xff] }
  0x85   : > { %861 = vrot.lane.b32.xlu0 %v857_v46, %s2274_s19 }
  0x87   : > { %867 = vrot.lane.b32.xlu1 %v860_v51, %s2274_s19 }
  0x89   : > { %863 = vrot.lane.b32.xlu0 %v858_v52, %s2274_s19  ;;  %v1978_v52 = vld [vmem:[%s2346_s25 + $0x141] ss:$2 sm:$0xf] }
  0x8a   : > { %v1082_v56 = vcombine.low %v1978_v52, %v1979_v53  ;;  %v2015_v53 = vld [vmem:[%s2346_s25 + $0x2b2] ss:$2 sm:$0xf] }
  0x8b   : > { %910 = vrot.lane.b32.xlu1 %v904_v57, %s2275_s20  ;;  %v1984_v57 = vld [vmem:[%s2346_s25 + $0x2c1] ss:$2 sm:$0xf] }
  0x8d   : > { %906 = vrot.lane.b32.xlu0 %v902_v58, %s2275_s20  ;;  %v279_v3 = vpop.permute.xlu1 %278  ;;  %v1985_v58 = vld [vmem:[%s2346_s25 + $0x2e1] ss:$2 sm:$0xf] }
  0x8e   : > { %290 = vst.msk [vmem:[#allocation2 + $0x8] sm:$0xff] %vm288_vm2, %v279_v3 }
  0x8f   : > { %v277_v6 = vpop.permute.xlu0 %276  ;;  %912 = vrot.lane.b32.xlu1 %v905_v63, %s2275_s20  ;;  %v1085_v63 = vcombine.low %v1984_v57, %v1985_v58  ;;  %v2010_v57 = vld [vmem:[%s2346_s25 + $0x152] ss:$2 sm:$0xf] }
  0x90   : > { %289 = vst.msk [vmem:[#allocation2] sm:$0xff] %vm288_vm2, %v277_v6  ;;  %v2011_v58 = vld [vmem:[%s2346_s25 + $0x172] ss:$2 sm:$0xf] }
  0x91   : > { %908 = vrot.lane.b32.xlu0 %v903_v0, %s2275_s20  ;;  %v283_v11 = vpop.permute.xlu1 %282  ;;  %v1083_v0 = vcombine.low %v1980_v60, %v1981_v61  ;;  %s2285_s20 = smov 100  }
  0x92   : > { %292 = vst.msk [vmem:[#allocation2 + $0x18] sm:$0xff] %vm288_vm2, %v283_v11 }
  0x93   : > { %v281_v14 = vpop.permute.xlu0 %280  ;;  %955 = vrot.lane.b32.xlu1 %v949_v7, %s2276_s21  ;;  %v1129_v7 = vcombine.low %v1990_v1, %v1991_v2  ;;  %v1426_v1 = vld [vmem:[%s2684_s1 + $0x20] sm:$0xff]  ;;  %v1427_v2 = vld [vmem:[%s2684_s1 + $0x28] sm:$0xff] }
  0x94   : > { %291 = vst.msk [vmem:[#allocation2 + $0x10] sm:$0xff] %vm288_vm2, %v281_v14  ;;  %vm1008_vm2 = vcmask 589344  }
  0x95   : > { %951 = vrot.lane.b32.xlu0 %v947_v8, %s2276_s21  ;;  %v326_v19 = vpop.permute.xlu1 %325  ;;  %v1127_v8 = vcombine.low %v1986_v4, %v1987_v5  ;;  %v2012_v4 = vld [vmem:[%s2346_s25 + $0x192] ss:$2 sm:$0xf] }
  0x96   : > { %336 = vst.msk [vmem:[#allocation2 + $0x10] sm:$0xff] %vm333_vm3, %v326_v19  ;;  %v2013_v5 = vld [vmem:[%s2346_s25 + $0x1b2] ss:$2 sm:$0xf] }
  0x97   : > { %v322_v22 = vpop.permute.xlu0 %321  ;;  %957 = vrot.lane.b32.xlu1 %v950_v15, %s2276_s21  ;;  %v1130_v15 = vcombine.low %v1992_v9, %v1993_v10  ;;  %v2022_v9 = vld [vmem:[%s2346_s25 + $0x2a0] ss:$2 sm:$0xf]  ;;  %v1263_v10 = vcombine.low %v2012_v4, %v2013_v5 }
  0x98   : > { %334 = vst.msk [vmem:[#allocation2] sm:$0xff] %vm333_vm3, %v322_v22  ;;  %v2036_v4 = vld [vmem:[%s2346_s25 + $0x1a2] ss:$2 sm:$0xf] }
  0x99   : > { %953 = vrot.lane.b32.xlu0 %v948_v16, %s2276_s21  ;;  %v328_v27 = vpop.permute.xlu1 %327  ;;  %v1128_v16 = vcombine.low %v1988_v12, %v1989_v13  ;;  %s2283_s21 = smov 92   ;;  %v1428_v12 = vld [vmem:[%s2684_s1 + $0x30] sm:$0xff]  ;;  %v1429_v13 = vld [vmem:[%s2684_s1 + $0x38] sm:$0xff]  ;;  %v2037_v5 = vld [vmem:[%s2346_s25 + $0x1c2] ss:$2 sm:$0xf] }
  0x9a   : > { %337 = vst.msk [vmem:[#allocation2 + $0x18] sm:$0xff] %vm333_vm3, %v328_v27 }
  0x9b   : > { %v324_v30 = vpop.permute.xlu0 %323  ;;  %1000 = vrot.lane.b32.xlu1 %v994_v23, %s2277_s22  ;;  %v1174_v23 = vcombine.low %v1998_v17, %v1999_v18  ;;  %v2115_v17 = vpack.c.bf16 %v1429_v13, %v1428_v12 }
  0x9c   : > { %335 = vst.msk [vmem:[#allocation2 + $0x8] sm:$0xff] %vm333_vm3, %v324_v30  ;;  %vm1053_vm3 = vcmask 622144  }
  0x9d   : > { %996 = vrot.lane.b32.xlu0 %v992_v24, %s2277_s22  ;;  %v371_v35 = vpop.permute.xlu1 %370  ;;  %v1172_v24 = vcombine.low %v1994_v20, %v1995_v21  ;;  %v2024_v20 = vld [vmem:[%s2346_s25 + $0x2e0] ss:$2 sm:$0xf] }
  0x9e   : > { %381 = vst.msk [vmem:[#allocation2 + $0x10] sm:$0xff] %vm378_vm4, %v371_v35 }
  0x9f   : > { %v367_v38 = vpop.permute.xlu0 %366  ;;  %1002 = vrot.lane.b32.xlu1 %v995_v31, %s2277_s22  ;;  %v1175_v31 = vcombine.low %v2000_v25, %v2001_v26  ;;  %v2020_v26 = vld [vmem:[%s2346_s25 + $0x1a0] ss:$2 sm:$0xf] }
  0xa0   : > { %379 = vst.msk [vmem:[#allocation2] sm:$0xff] %vm378_vm4, %v367_v38 }
  0xa1   : > { %998 = vrot.lane.b32.xlu0 %v993_v32, %s2277_s22  ;;  %v373_v43 = vpop.permute.xlu1 %372  ;;  %v1173_v32 = vcombine.low %v1996_v28, %v1997_v29 }
  0xa2   : > { %382 = vst.msk [vmem:[#allocation2 + $0x18] sm:$0xff] %vm378_vm4, %v373_v43  ;;  %v1422_v43 = vld [vmem:[%s2684_s1] sm:$0xff] }
  0xa3   : > { %v369_v46 = vpop.permute.xlu0 %368  ;;  %1045 = vrot.lane.b32.xlu1 %v1039_v39, %s2278_s23  ;;  %v1219_v39 = vcombine.low %v2006_v33, %v2007_v34  ;;  %v2031_v33 = vld [vmem:[%s2346_s25 + $0x2c1] ss:$2 sm:$0xf]  ;;  %v1432_v34 = vld [vmem:[%s2684_s1 + $0x50] sm:$0xff] }
  0xa4   : > { %380 = vst.msk [vmem:[#allocation2 + $0x8] sm:$0xff] %vm378_vm4, %v369_v46  ;;  %v2004_v46 = vld [vmem:[%s2346_s25 + $0x191] ss:$2 sm:$0xf]  ;;  %vm1098_vm4 = vcmask 654944  }
  0xa5   : > { %1041 = vrot.lane.b32.xlu0 %v1037_v40, %s2278_s23  ;;  %v416_v51 = vpop.permute.xlu1 %415  ;;  %v2008_v40 = vld [vmem:[%s2346_s25 + $0x2d1] ss:$2 sm:$0xf] }
  0xa6   : > { %426 = vst.msk [vmem:[#allocation2 + $0x10] sm:$0xff] %vm423_vm5, %v416_v51  ;;  %v1220_v50 = vcombine.low %v2008_v40, %v2009_v42  ;;  %v2014_v51 = vld [vmem:[%s2346_s25 + $0x292] ss:$2 sm:$0xf] }
  0xa7   : > { %v412_v54 = vpop.permute.xlu0 %411  ;;  %1047 = vrot.lane.b32.xlu1 %v1040_v47, %s2278_s23  ;;  %v2005_v47 = vld [vmem:[%s2346_s25 + $0x1b1] ss:$2 sm:$0xf]  ;;  %v1264_v61 = vcombine.low %v2014_v51, %v2015_v53  ;;  %v2032_v42 = vld [vmem:[%s2346_s25 + $0x2e1] ss:$2 sm:$0xf] }
  0xa8   : > { %424 = vst.msk [vmem:[#allocation2] sm:$0xff] %vm423_vm5, %v412_v54  ;;  %v1218_v52 = vcombine.low %v2004_v46, %v2005_v47  ;;  %v1424_v54 = vld [vmem:[%s2684_s1 + $0x10] sm:$0xff]  ;;  %v1435_v46 = vld [vmem:[%s2684_s1 + $0x68] sm:$0xff] }
  0xa9   : > { %1043 = vrot.lane.b32.xlu0 %v1038_v48, %s2278_s23  ;;  %v418_v59 = vpop.permute.xlu1 %417  ;;  %v2103_v48 = vpack.c.bf16 %v1423_v44, %v1422_v43  ;;  %v2033_v44 = vld [vmem:[%s2346_s25 + $0x301] ss:$2 sm:$0xf]  ;;  %v1436_v53 = vld [vmem:[%s2684_s1 + $0x70] sm:$0xff] }
  0xaa   : > { %427 = vst.msk [vmem:[#allocation2 + $0x18] sm:$0xff] %vm423_vm5, %v418_v59 }
  0xab   : > { %v414_v62 = vpop.permute.xlu0 %413  ;;  %1090 = vrot.lane.b32.xlu1 %v1084_v55, %s2279_s24  ;;  %2104 = vmatprep.subr.bf16.mxu0 %v2103_v48  ;;  %v1425_v55 = vld [vmem:[%s2684_s1 + $0x18] sm:$0xff] }
  0xac   : > { %425 = vst.msk [vmem:[#allocation2 + $0x8] sm:$0xff] %vm423_vm5, %v414_v62  ;;  %2135 = vmatprep.subr.bf16.mxu1 %v2103_v48  ;;  %2106 = vmatpush3.bf16.msra.mxu0 %v2103_v48  ;;  %v2107_v59 = vpack.c.bf16 %v1425_v55, %v1424_v54  ;;  %v2016_v62 = vld [vmem:[%s2346_s25 + $0x2d2] ss:$2 sm:$0xf]  ;;  %vm1143_vm5 = vcmask 687744  }
  0xad   : > { %1086 = vrot.lane.b32.xlu0 %v1082_v56, %s2279_s24  ;;  %v461_v3 = vpop.permute.xlu1 %460  ;;  %2143 = vmatpush3.bf16.msra.mxu1 %v2103_v48  ;;  %v2028_v48 = vld [vmem:[%s2346_s25 + $0x1a1] ss:$2 sm:$0xf]  ;;  %v1437_v54 = vld [vmem:[%s2684_s1 + $0x78] sm:$0xff] }
  0xae   : > { %471 = vst.msk [vmem:[#allocation2 + $0x10] sm:$0xff] %vm468_vm6, %v461_v3  ;;  %2108 = vmatprep.subr.bf16.mxu0 %v2107_v59  ;;  %2136 = vmatprep.subr.bf16.mxu1 %v2107_v59 }
  0xaf   : > { %v457_v6 = vpop.permute.xlu0 %456  ;;  %1092 = vrot.lane.b32.xlu1 %v1085_v63, %s2279_s24  ;;  %v1262_v63 = vcombine.low %v2010_v57, %v2011_v58  ;;  %v2039_v57 = vld [vmem:[%s2346_s25 + $0x2c2] ss:$2 sm:$0xf]  ;;  %v2131_v58 = vpack.c.bf16 %v1437_v54, %v1436_v53 }
  0xb0   : > { %469 = vst.msk [vmem:[#allocation2] sm:$0xff] %vm468_vm6, %v457_v6  ;;  %2110 = vmatpush3.bf16.msra.mxu0 %v2107_v59  ;;  %v2111_v6 = vpack.c.bf16 %v1427_v2, %v1426_v1  ;;  %v2040_v1 = vld [vmem:[%s2346_s25 + $0x2e2] ss:$2 sm:$0xf] }
  0xb1   : > { %1088 = vrot.lane.b32.xlu0 %v1083_v0, %s2279_s24  ;;  %v463_v11 = vpop.permute.xlu1 %462  ;;  %v2017_v0 = vld [vmem:[%s2346_s25 + $0x2f2] ss:$2 sm:$0xf]  ;;  %2144 = vmatpush3.bf16.msra.mxu1 %v2107_v59  ;;  %v2041_v2 = vld [vmem:[%s2346_s25 + $0x302] ss:$2 sm:$0xf] }
  0xb2   : > { %472 = vst.msk [vmem:[#allocation2 + $0x18] sm:$0xff] %vm468_vm6, %v463_v11  ;;  %2112 = vmatprep.subr.bf16.mxu0 %v2111_v6  ;;  %v2023_v11 = vld [vmem:[%s2346_s25 + $0x2c0] ss:$2 sm:$0xf]  ;;  %2137 = vmatprep.subr.bf16.mxu1 %v2111_v6 }
  0xb3   : > { %v459_v14 = vpop.permute.xlu0 %458  ;;  %1135 = vrot.lane.b32.xlu1 %v1129_v7, %s2280_s26 }
  0xb4   : > { %470 = vst.msk [vmem:[#allocation2 + $0x8] sm:$0xff] %vm468_vm6, %v459_v14  ;;  %2114 = vmatpush3.bf16.msra.mxu0 %v2111_v6  ;;  %vm1188_vm6 = vcmask 720544  }
  0xb5   : > { %1131 = vrot.lane.b32.xlu0 %v1127_v8, %s2280_s26  ;;  %v506_v19 = vpop.permute.xlu1 %505  ;;  %v1265_v8 = vcombine.low %v2016_v62, %v2017_v0  ;;  %2145 = vmatpush3.bf16.msra.mxu1 %v2111_v6 }
  0xb6   : > { %516 = vst.msk [vmem:[#allocation2 + $0x10] sm:$0xff] %vm513_vm7, %v506_v19  ;;  %v1309_v19 = vcombine.low %v2022_v9, %v2023_v11  ;;  %2116 = vmatprep.subr.bf16.mxu0 %v2115_v17  ;;  %2138 = vmatprep.subr.bf16.mxu1 %v2115_v17 }
  0xb7   : > { %v502_v22 = vpop.permute.xlu0 %501  ;;  %1137 = vrot.lane.b32.xlu1 %v1130_v15, %s2280_s26  ;;  %v2018_v15 = vld [vmem:[%s2346_s25 + $0x160] ss:$2 sm:$0xf] }
  0xb8   : > { %514 = vst.msk [vmem:[#allocation2] sm:$0xff] %vm513_vm7, %v502_v22  ;;  %v2025_v22 = vld [vmem:[%s2346_s25 + $0x300] ss:$2 sm:$0xf]  ;;  %2118 = vmatpush3.bf16.msra.mxu0 %v2115_v17 }
  0xb9   : > { %1133 = vrot.lane.b32.xlu0 %v1128_v16, %s2280_s26  ;;  %v508_v27 = vpop.permute.xlu1 %507  ;;  %v2019_v16 = vld [vmem:[%s2346_s25 + $0x180] ss:$2 sm:$0xf]  ;;  %2146 = vmatpush3.bf16.msra.mxu1 %v2115_v17  ;;  %s2286_s26 = smov 104  }
  0xba   : > { %517 = vst.msk [vmem:[#allocation2 + $0x18] sm:$0xff] %vm513_vm7, %v508_v27  ;;  %v1307_v21 = vcombine.low %v2018_v15, %v2019_v16  ;;  %v2021_v27 = vld [vmem:[%s2346_s25 + $0x1c0] ss:$2 sm:$0xf] }
  0xbb   : > { %v504_v30 = vpop.permute.xlu0 %503  ;;  %1180 = vrot.lane.b32.xlu1 %v1174_v23, %s2281_s27  ;;  %v1430_v23 = vld [vmem:[%s2684_s1 + $0x40] sm:$0xff] }
  0xbc   : > { %515 = vst.msk [vmem:[#allocation2 + $0x8] sm:$0xff] %vm513_vm7, %v504_v30  ;;  %v1310_v30 = vcombine.low %v2024_v20, %v2025_v22  ;;  %vm1233_vm7 = vcmask 753344  }
  0xbd   : > { %1176 = vrot.lane.b32.xlu0 %v1172_v24, %s2281_s27  ;;  %v551_v35 = vpop.permute.xlu1 %550  ;;  %v1431_v24 = vld [vmem:[%s2684_s1 + $0x48] sm:$0xff] }
  0xbe   : > { %561 = vst.msk [vmem:[#allocation2 + $0x10] sm:$0xff] %vm558_vm8, %v551_v35  ;;  %v2119_v28 = vpack.c.bf16 %v1431_v24, %v1430_v23  ;;  %v1433_v35 = vld [vmem:[%s2684_s1 + $0x58] sm:$0xff] }
  0xbf   : > { %v547_v38 = vpop.permute.xlu0 %546  ;;  %1182 = vrot.lane.b32.xlu1 %v1175_v31, %s2281_s27  ;;  %v2030_v31 = vld [vmem:[%s2346_s25 + $0x2a1] ss:$2 sm:$0xf] }
  0xc0   : > { %559 = vst.msk [vmem:[#allocation2] sm:$0xff] %vm558_vm8, %v547_v38  ;;  %2120 = vmatprep.subr.bf16.mxu0 %v2119_v28  ;;  %2139 = vmatprep.subr.bf16.mxu1 %v2119_v28  ;;  %v2027_v38 = vld [vmem:[%s2346_s25 + $0x181] ss:$2 sm:$0xf] }
  0xc1   : > { %1178 = vrot.lane.b32.xlu0 %v1173_v32, %s2281_s27  ;;  %v553_v45 = vpop.permute.xlu1 %552  ;;  %v1308_v32 = vcombine.low %v2020_v26, %v2021_v27  ;;  %2122 = vmatpush3.bf16.msra.mxu0 %v2119_v28  ;;  %v1352_v43 = vcombine.low %v2026_v37, %v2027_v38  ;;  %s1825_s27 = sshll.u32 %s2698_s13, 3 }
  0xc2   : > { %562 = vst.msk [vmem:[#allocation2 + $0x18] sm:$0xff] %vm558_vm8, %v553_v45  ;;  %2147 = vmatpush3.bf16.msra.mxu1 %v2119_v28  ;;  %v1434_v45 = vld [vmem:[%s2684_s1 + $0x60] sm:$0xff] }
  0xc3   : > { %v549_v49 = vpop.permute.xlu0 %548  ;;  %1225 = vrot.lane.b32.xlu1 %v1219_v39, %s2282_s5  ;;  %v2123_v39 = vpack.c.bf16 %v1433_v35, %v1432_v34 }
  0xc4   : > { %560 = vst.msk [vmem:[#allocation2 + $0x8] sm:$0xff] %vm558_vm8, %v549_v49  ;;  %v2029_v49 = vld [vmem:[%s2346_s25 + $0x1c1] ss:$2 sm:$0xf]  ;;  %vm1278_vm8 = vcmask 786144  }
  0xc5   : > { %1221 = vrot.lane.b32.xlu0 %v1217_v41, %s2282_s5  ;;  %v596_v56 = vpop.permute.xlu1 %595  ;;  %v1354_v41 = vcombine.low %v2030_v31, %v2031_v33  ;;  %2124 = vmatprep.subr.bf16.mxu0 %v2123_v39  ;;  %v1353_v55 = vcombine.low %v2028_v48, %v2029_v49 }
  0xc6   : > { %606 = vst.msk [vmem:[#allocation2 + $0x10] sm:$0xff] %vm603_vm9, %v596_v56  ;;  %2140 = vmatprep.subr.bf16.mxu1 %v2123_v39  ;;  %2126 = vmatpush3.bf16.msra.mxu0 %v2123_v39  ;;  %v2038_v56 = vld [vmem:[%s2346_s25 + $0x2a2] ss:$2 sm:$0xf] }
  0xc7   : > { %v592_v60 = vpop.permute.xlu0 %591  ;;  %1227 = vrot.lane.b32.xlu1 %v1220_v50, %s2282_s5  ;;  %2148 = vmatpush3.bf16.msra.mxu1 %v2123_v39  ;;  %v2127_v50 = vpack.c.bf16 %v1435_v46, %v1434_v45 }
  0xc8   : > { %604 = vst.msk [vmem:[#allocation2] sm:$0xff] %vm603_vm9, %v592_v60  ;;  %v2034_v60 = vld [vmem:[%s2346_s25 + $0x162] ss:$2 sm:$0xf] }
  0xc9   : > { %1223 = vrot.lane.b32.xlu0 %v1218_v52, %s2282_s5  ;;  %v598_v3 = vpop.permute.xlu1 %597  ;;  %v1355_v52 = vcombine.low %v2032_v42, %v2033_v44  ;;  %2128 = vmatprep.subr.bf16.mxu0 %v2127_v50 }
  0xca   : > { %607 = vst.msk [vmem:[#allocation2 + $0x18] sm:$0xff] %vm603_vm9, %v598_v3  ;;  %2141 = vmatprep.subr.bf16.mxu1 %v2127_v50  ;;  %2130 = vmatpush3.bf16.msra.mxu0 %v2127_v50 }
  0xcb   : > { %v594_v7 = vpop.permute.xlu0 %593  ;;  %1270 = vrot.lane.b32.xlu1 %v1264_v61, %s2283_s21  ;;  %v2035_v61 = vld [vmem:[%s2346_s25 + $0x182] ss:$2 sm:$0xf]  ;;  %2149 = vmatpush3.bf16.msra.mxu1 %v2127_v50  ;;  %s1824_s25 = sshll.u32 %s2700_s12, 2 }
  0xcc   : > { %605 = vst.msk [vmem:[#allocation2 + $0x8] sm:$0xff] %vm603_vm9, %v594_v7  ;;  %2132 = vmatprep.subr.bf16.mxu0 %v2131_v58  ;;  %2142 = vmatprep.subr.bf16.mxu1 %v2131_v58  ;;  %v1397_v0 = vcombine.low %v2034_v60, %v2035_v61  ;;  %v1400_v7 = vcombine.low %v2040_v1, %v2041_v2  ;;  %vm1323_vm9 = vcmask 818944   ;;  %s204_s28 = sadd.s32 %s1825_s27, %s1824_s25 }
  0xcd   : > { %1266 = vrot.lane.b32.xlu0 %v1262_v63, %s2283_s21  ;;  %v641_v14 = vpop.permute.xlu1 %640  ;;  %v1399_v63 = vcombine.low %v2038_v56, %v2039_v57 }
  0xce   : > { %651 = vst.msk [vmem:[#allocation2 + $0x10] sm:$0xff] %vm648_vm10, %v641_v14  ;;  %2134 = vmatpush3.bf16.msra.mxu0 %v2131_v58 }
  0xcf   : > { %v637_v18 = vpop.permute.xlu0 %636  ;;  %1272 = vrot.lane.b32.xlu1 %v1265_v8, %s2283_s21  ;;  %2150 = vmatpush3.bf16.msra.mxu1 %v2131_v58  ;;  %v1398_v8 = vcombine.low %v2036_v4, %v2037_v5 }
  0xd0   : > { %649 = vst.msk [vmem:[#allocation2] sm:$0xff] %vm648_vm10, %v637_v18 }
  0xd1   : > { %1268 = vrot.lane.b32.xlu0 %v1263_v10, %s2283_s21  ;;  %v643_v25 = vpop.permute.xlu1 %642 }
  0xd2   : > { %652 = vst.msk [vmem:[#allocation2 + $0x18] sm:$0xff] %vm648_vm10, %v643_v25 }
  0xd3   : > { %v639_v29 = vpop.permute.xlu0 %638  ;;  %1315 = vrot.lane.b32.xlu1 %v1309_v19, %s2284_s4 }
  0xd4   : > { %650 = vst.msk [vmem:[#allocation2 + $0x8] sm:$0xff] %vm648_vm10, %v639_v29  ;;  %vm1368_vm10 = vcmask 851744  }
  0xd5   : > { %1311 = vrot.lane.b32.xlu0 %v1307_v21, %s2284_s4  ;;  %v686_v36 = vpop.permute.xlu1 %685 }
  0xd6   : > { %696 = vst.msk [vmem:[#allocation2 + $0x10] sm:$0xff] %vm693_vm11, %v686_v36 }
  0xd7   : > { %v682_v40 = vpop.permute.xlu0 %681  ;;  %1317 = vrot.lane.b32.xlu1 %v1310_v30, %s2284_s4 }
  0xd8   : > { %694 = vst.msk [vmem:[#allocation2] sm:$0xff] %vm693_vm11, %v682_v40 }
  0xd9   : > { %1313 = vrot.lane.b32.xlu0 %v1308_v32, %s2284_s4  ;;  %v688_v47 = vpop.permute.xlu1 %687  ;;  %s1826_s4 = sshll.u32 %s204_s28, 3 }
  0xda   : > { %697 = vst.msk [vmem:[#allocation2 + $0x18] sm:$0xff] %vm693_vm11, %v688_v47  ;;  %s206_s7 = scalar_lea.vmem %s2686_s3, %s1826_s4 }
  0xdb   : > { %v684_v51 = vpop.permute.xlu0 %683  ;;  %1360 = vrot.lane.b32.xlu1 %v1354_v41, %s2285_s20 }
  0xdc   : > { %695 = vst.msk [vmem:[#allocation2 + $0x8] sm:$0xff] %vm693_vm11, %v684_v51  ;;  %vm1413_vm11 = vcmask 884544  }
  0xdd   : > { %1356 = vrot.lane.b32.xlu0 %v1352_v43, %s2285_s20  ;;  %v731_v59 = vpop.permute.xlu1 %730 }
  0xde   : > { %741 = vst.msk [vmem:[#allocation2 + $0x10] sm:$0xff] %vm738_vm12, %v731_v59 }
  0xdf   : > { %v727_v62 = vpop.permute.xlu0 %726  ;;  %1362 = vrot.lane.b32.xlu1 %v1355_v52, %s2285_s20 }
  0xe0   : > { %739 = vst.msk [vmem:[#allocation2] sm:$0xff] %vm738_vm12, %v727_v62 }
  0xe1   : > { %1358 = vrot.lane.b32.xlu0 %v1353_v55, %s2285_s20  ;;  %v733_v3 = vpop.permute.xlu1 %732 }
  0xe2   : > { %742 = vst.msk [vmem:[#allocation2 + $0x18] sm:$0xff] %vm738_vm12, %v733_v3 }
  0xe3   : > { %v729_v6 = vpop.permute.xlu0 %728  ;;  %1405 = vrot.lane.b32.xlu1 %v1399_v63, %s2286_s26 }
  0xe4   : > { %740 = vst.msk [vmem:[#allocation2 + $0x8] sm:$0xff] %vm738_vm12, %v729_v6  ;;  %vm1534_vm12 = vcmask 64512  }
  0xe5   : > { %1401 = vrot.lane.b32.xlu0 %v1397_v0, %s2286_s26  ;;  %v776_v9 = vpop.permute.xlu1 %775 }
  0xe6   : > { %786 = vst.msk [vmem:[#allocation2 + $0x10] sm:$0xff] %vm783_vm13, %v776_v9  ;;  %v2042_v9 = vld [vmem:[%s2685_s2] ss:$0 sm:$0xff] }
  0xe7   : > { %v772_v10 = vpop.permute.xlu0 %771  ;;  %1407 = vrot.lane.b32.xlu1 %v1400_v7, %s2286_s26 }
  0xe8   : > { %784 = vst.msk [vmem:[#allocation2] sm:$0xff] %vm783_vm13, %v772_v10 }
  0xe9   : > { %1403 = vrot.lane.b32.xlu0 %v1398_v8, %s2286_s26  ;;  %v778_v11 = vpop.permute.xlu1 %777 }
  0xea   : > { %787 = vst.msk [vmem:[#allocation2 + $0x18] sm:$0xff] %vm783_vm13, %v778_v11 }
  0xeb   : > { %v774_v12 = vpop.permute.xlu0 %773 }
  0xec   : > { %785 = vst.msk [vmem:[#allocation2 + $0x8] sm:$0xff] %vm783_vm13, %v774_v12 }
  0xed   : > { %v821_v13 = vpop.permute.xlu1 %820 }
  0xee   : > { %831 = vst.msk [vmem:[#allocation2 + $0x10] sm:$0xff] %vm828_vm14, %v821_v13 }
  0xef   : > { %v817_v14 = vpop.permute.xlu0 %816 }
  0xf0   : > { %829 = vst.msk [vmem:[#allocation2] sm:$0xff] %vm828_vm14, %v817_v14 }
  0xf1   : > { %v823_v15 = vpop.permute.xlu1 %822 }
  0xf2   : > { %832 = vst.msk [vmem:[#allocation2 + $0x18] sm:$0xff] %vm828_vm14, %v823_v15 }
  0xf3   : > { %v819_v16 = vpop.permute.xlu0 %818 }
  0xf4   : > { %830 = vst.msk [vmem:[#allocation2 + $0x8] sm:$0xff] %vm828_vm14, %v819_v16 }
  0xf5   : > { %v866_v17 = vpop.permute.xlu1 %865 }
  0xf6   : > { %876 = vst.msk [vmem:[#allocation2 + $0x10] sm:$0xff] %vm873_vm15, %v866_v17 }
  0xf7   : > { %v862_v18 = vpop.permute.xlu0 %861 }
  0xf8   : > { %874 = vst.msk [vmem:[#allocation2] sm:$0xff] %vm873_vm15, %v862_v18 }
  0xf9   : > { %v868_v19 = vpop.permute.xlu1 %867 }
  0xfa   : > { %877 = vst.msk [vmem:[#allocation2 + $0x18] sm:$0xff] %vm873_vm15, %v868_v19 }
  0xfb   : > { %v864_v20 = vpop.permute.xlu0 %863 }
  0xfc   : > { %875 = vst.msk [vmem:[#allocation2 + $0x8] sm:$0xff] %vm873_vm15, %v864_v20 }
  0xfd   : > { %v911_v21 = vpop.permute.xlu1 %910 }
  0xfe   : > { %921 = vst.msk [vmem:[#allocation2 + $0x10] sm:$0xff] %vm918_vm0, %v911_v21 }
  0xff   : > { %v907_v22 = vpop.permute.xlu0 %906 }
 0x100   : > { %919 = vst.msk [vmem:[#allocation2] sm:$0xff] %vm918_vm0, %v907_v22 }
 0x101   : > { %v913_v23 = vpop.permute.xlu1 %912 }
 0x102   : > { %922 = vst.msk [vmem:[#allocation2 + $0x18] sm:$0xff] %vm918_vm0, %v913_v23 }
 0x103   : > { %v909_v24 = vpop.permute.xlu0 %908 }
 0x104   : > { %920 = vst.msk [vmem:[#allocation2 + $0x8] sm:$0xff] %vm918_vm0, %v909_v24 }
 0x105   : > { %v956_v25 = vpop.permute.xlu1 %955 }
 0x106   : > { %966 = vst.msk [vmem:[#allocation2 + $0x10] sm:$0xff] %vm963_vm1, %v956_v25 }
 0x107   : > { %v952_v26 = vpop.permute.xlu0 %951 }
 0x108   : > { %964 = vst.msk [vmem:[#allocation2] sm:$0xff] %vm963_vm1, %v952_v26 }
 0x109   : > { %v958_v27 = vpop.permute.xlu1 %957 }
 0x10a   : > { %967 = vst.msk [vmem:[#allocation2 + $0x18] sm:$0xff] %vm963_vm1, %v958_v27 }
 0x10b   : > { %v954_v28 = vpop.permute.xlu0 %953 }
 0x10c   : > { %965 = vst.msk [vmem:[#allocation2 + $0x8] sm:$0xff] %vm963_vm1, %v954_v28 }
 0x10d   : > { %v1001_v29 = vpop.permute.xlu1 %1000 }
 0x10e   : > { %1011 = vst.msk [vmem:[#allocation2 + $0x10] sm:$0xff] %vm1008_vm2, %v1001_v29 }
 0x10f   : > { %v997_v30 = vpop.permute.xlu0 %996 }
 0x110   : > { %1009 = vst.msk [vmem:[#allocation2] sm:$0xff] %vm1008_vm2, %v997_v30 }
 0x111   : > { %v1003_v31 = vpop.permute.xlu1 %1002 }
 0x112   : > { %1012 = vst.msk [vmem:[#allocation2 + $0x18] sm:$0xff] %vm1008_vm2, %v1003_v31 }
 0x113   : > { %v999_v32 = vpop.permute.xlu0 %998 }
 0x114   : > { %1010 = vst.msk [vmem:[#allocation2 + $0x8] sm:$0xff] %vm1008_vm2, %v999_v32 }
 0x115   : > { %v1046_v33 = vpop.permute.xlu1 %1045 }
 0x116   : > { %1056 = vst.msk [vmem:[#allocation2 + $0x10] sm:$0xff] %vm1053_vm3, %v1046_v33 }
 0x117   : > { %v1042_v34 = vpop.permute.xlu0 %1041 }
 0x118   : > { %1054 = vst.msk [vmem:[#allocation2] sm:$0xff] %vm1053_vm3, %v1042_v34 }
 0x119   : > { %v1048_v35 = vpop.permute.xlu1 %1047 }
 0x11a   : > { %1057 = vst.msk [vmem:[#allocation2 + $0x18] sm:$0xff] %vm1053_vm3, %v1048_v35 }
 0x11b   : > { %v1044_v36 = vpop.permute.xlu0 %1043 }
 0x11c   : > { %1055 = vst.msk [vmem:[#allocation2 + $0x8] sm:$0xff] %vm1053_vm3, %v1044_v36 }
 0x11d   : > { %v1091_v37 = vpop.permute.xlu1 %1090 }
 0x11e   : > { %1101 = vst.msk [vmem:[#allocation2 + $0x10] sm:$0xff] %vm1098_vm4, %v1091_v37 }
 0x11f   : > { %v1087_v38 = vpop.permute.xlu0 %1086 }
 0x120   : > { %1099 = vst.msk [vmem:[#allocation2] sm:$0xff] %vm1098_vm4, %v1087_v38 }
 0x121   : > { %v1093_v39 = vpop.permute.xlu1 %1092 }
 0x122   : > { %1102 = vst.msk [vmem:[#allocation2 + $0x18] sm:$0xff] %vm1098_vm4, %v1093_v39 }
 0x123   : > { %v1089_v40 = vpop.permute.xlu0 %1088 }
 0x124   : > { %1100 = vst.msk [vmem:[#allocation2 + $0x8] sm:$0xff] %vm1098_vm4, %v1089_v40 }
 0x125   : > { %v1136_v41 = vpop.permute.xlu1 %1135 }
 0x126   : > { %1146 = vst.msk [vmem:[#allocation2 + $0x10] sm:$0xff] %vm1143_vm5, %v1136_v41 }
 0x127   : > { %v1132_v42 = vpop.permute.xlu0 %1131 }
 0x128   : > { %1144 = vst.msk [vmem:[#allocation2] sm:$0xff] %vm1143_vm5, %v1132_v42 }
 0x129   : > { %v1138_v43 = vpop.permute.xlu1 %1137 }
 0x12a   : > { %1147 = vst.msk [vmem:[#allocation2 + $0x18] sm:$0xff] %vm1143_vm5, %v1138_v43 }
 0x12b   : > { %v1134_v44 = vpop.permute.xlu0 %1133 }
 0x12c   : > { %1145 = vst.msk [vmem:[#allocation2 + $0x8] sm:$0xff] %vm1143_vm5, %v1134_v44 }
 0x12d   : > { %v1181_v45 = vpop.permute.xlu1 %1180 }
 0x12e   : > { %1191 = vst.msk [vmem:[#allocation2 + $0x10] sm:$0xff] %vm1188_vm6, %v1181_v45 }
 0x12f   : > { %v1177_v46 = vpop.permute.xlu0 %1176 }
 0x130   : > { %1189 = vst.msk [vmem:[#allocation2] sm:$0xff] %vm1188_vm6, %v1177_v46 }
 0x131   : > { %v1183_v47 = vpop.permute.xlu1 %1182 }
 0x132   : > { %1192 = vst.msk [vmem:[#allocation2 + $0x18] sm:$0xff] %vm1188_vm6, %v1183_v47 }
 0x133   : > { %v1179_v48 = vpop.permute.xlu0 %1178 }
 0x134   : > { %1190 = vst.msk [vmem:[#allocation2 + $0x8] sm:$0xff] %vm1188_vm6, %v1179_v48 }
 0x135   : > { %v1226_v49 = vpop.permute.xlu1 %1225 }
 0x136   : > { %1236 = vst.msk [vmem:[#allocation2 + $0x10] sm:$0xff] %vm1233_vm7, %v1226_v49 }
 0x137   : > { %v1222_v50 = vpop.permute.xlu0 %1221 }
 0x138   : > { %1234 = vst.msk [vmem:[#allocation2] sm:$0xff] %vm1233_vm7, %v1222_v50 }
 0x139   : > { %v1228_v51 = vpop.permute.xlu1 %1227 }
 0x13a   : > { %1237 = vst.msk [vmem:[#allocation2 + $0x18] sm:$0xff] %vm1233_vm7, %v1228_v51 }
 0x13b   : > { %v1224_v52 = vpop.permute.xlu0 %1223 }
 0x13c   : > { %1235 = vst.msk [vmem:[#allocation2 + $0x8] sm:$0xff] %vm1233_vm7, %v1224_v52 }
 0x13d   : > { %v1271_v53 = vpop.permute.xlu1 %1270 }
 0x13e   : > { %1281 = vst.msk [vmem:[#allocation2 + $0x10] sm:$0xff] %vm1278_vm8, %v1271_v53 }
 0x13f   : > { %v1267_v54 = vpop.permute.xlu0 %1266 }
 0x140   : > { %1279 = vst.msk [vmem:[#allocation2] sm:$0xff] %vm1278_vm8, %v1267_v54 }
 0x141   : > { %v1273_v55 = vpop.permute.xlu1 %1272 }
 0x142   : > { %1282 = vst.msk [vmem:[#allocation2 + $0x18] sm:$0xff] %vm1278_vm8, %v1273_v55 }
 0x143   : > { %v1269_v56 = vpop.permute.xlu0 %1268 }
 0x144   : > { %1280 = vst.msk [vmem:[#allocation2 + $0x8] sm:$0xff] %vm1278_vm8, %v1269_v56 }
 0x145   : > { %v1316_v57 = vpop.permute.xlu1 %1315 }
 0x146   : > { %1326 = vst.msk [vmem:[#allocation2 + $0x10] sm:$0xff] %vm1323_vm9, %v1316_v57 }
 0x147   : > { %v1312_v58 = vpop.permute.xlu0 %1311 }
 0x148   : > { %1324 = vst.msk [vmem:[#allocation2] sm:$0xff] %vm1323_vm9, %v1312_v58 }
 0x149   : > { %v1318_v59 = vpop.permute.xlu1 %1317 }
 0x14a   : > { %1327 = vst.msk [vmem:[#allocation2 + $0x18] sm:$0xff] %vm1323_vm9, %v1318_v59 }
 0x14b   : > { %v1314_v60 = vpop.permute.xlu0 %1313 }
 0x14c   : > { %1325 = vst.msk [vmem:[#allocation2 + $0x8] sm:$0xff] %vm1323_vm9, %v1314_v60 }
 0x14d   : > { %v1361_v61 = vpop.permute.xlu1 %1360 }
 0x14e   : > { %1371 = vst.msk [vmem:[#allocation2 + $0x10] sm:$0xff] %vm1368_vm10, %v1361_v61 }
 0x14f   : > { %v1357_v62 = vpop.permute.xlu0 %1356 }
 0x150   : > { %1369 = vst.msk [vmem:[#allocation2] sm:$0xff] %vm1368_vm10, %v1357_v62 }
 0x151   : > { %v1363_v63 = vpop.permute.xlu1 %1362 }
 0x152   : > { %1372 = vst.msk [vmem:[#allocation2 + $0x18] sm:$0xff] %vm1368_vm10, %v1363_v63 }
 0x153   : > { %v1359_v0 = vpop.permute.xlu0 %1358 }
 0x154   : > { %1370 = vst.msk [vmem:[#allocation2 + $0x8] sm:$0xff] %vm1368_vm10, %v1359_v0 }
 0x155   : > { %v1406_v1 = vpop.permute.xlu1 %1405 }
 0x156   : > { %1416 = vst.msk [vmem:[#allocation2 + $0x10] sm:$0xff] %vm1413_vm11, %v1406_v1 }
 0x157   : > { %v1402_v2 = vpop.permute.xlu0 %1401 }
 0x158   : > { %1414 = vst.msk [vmem:[#allocation2] sm:$0xff] %vm1413_vm11, %v1402_v2 }
 0x159   : > { %v1408_v3 = vpop.permute.xlu1 %1407 }
 0x15a   : > { %1417 = vst.msk [vmem:[#allocation2 + $0x18] sm:$0xff] %vm1413_vm11, %v1408_v3 }
 0x15b   : > { %v1404_v4 = vpop.permute.xlu0 %1403 }
 0x15c   : > { %1415 = vst.msk [vmem:[#allocation2 + $0x8] sm:$0xff] %vm1413_vm11, %v1404_v4 }
 0x15d   : > { %v1420_v5 = vld [vmem:[#allocation2 + $0x10] sm:$0xff] }
 0x15e   : > { %2100 = vmatprep.mubr.f32.mxu1 %v1420_v5 }
 0x15f   : > { %v1418_v6 = vld [vmem:[#allocation2] sm:$0xff] }
 0x160   : > { %2097 = vmatprep.mubr.f32.mxu0 %v1418_v6 }
 0x161   : > { %v1421_v7 = vld [vmem:[#allocation2 + $0x18] sm:$0xff] }
 0x162   : > { %2101 = vmatmul.mubr.f32.vlgmr.msra.gmra.mrb[0].mxu1 %v1421_v7 }
 0x163   : > { %v1419_v8 = vld [vmem:[#allocation2 + $0x8] sm:$0xff] }
 0x164   : > { %2098 = vmatmul.mubr.f32.vlgmr.msra.gmra.mrb[0].mxu0 %v1419_v8 }
 0x235   : > { %v2102_v10 = vpop.f32.mrb[0].mxu1 }
 0x236   : > { %v1527_v12 = vadd.f32 %v2102_v10, %v2042_v9  ;;  %v1521_v13 = vpop.f32.mrb[1].mxu1 }
 0x237   : > { %v2099_v11 = vpop.f32.mrb[0].mxu0  ;;  %v1522_v16 = vadd.f32 %v2042_v9, %v1521_v13 }
 0x238   : > { %v1517_v14 = vadd.f32 %v2099_v11, %v2042_v9  ;;  %v1511_v15 = vpop.f32.mrb[1].mxu0  ;;  %v1533_v17 = vmax.f32 %v1527_v12, 0.0 }
 0x239   : > { %v1512_v18 = vadd.f32 %v2042_v9, %v1511_v15  ;;  %v1532_v20 = vmax.f32 %v1522_v16, 0.0 }
 0x23a   : > { %v1531_v19 = vmax.f32 %v1517_v14, 0.0  ;;  %1538 = vst.msk [vmem:[%s206_s7 + $0x18] sm:$0xff] %vm1534_vm12, %v1533_v17 }
 0x23b   : > { %v1530_v21 = vmax.f32 %v1512_v18, 0.0  ;;  %1537 = vst.msk [vmem:[%s206_s7 + $0x10] sm:$0xff] %vm1534_vm12, %v1532_v20 }
 0x23c   : > { %1536 = vst.msk [vmem:[%s206_s7 + $0x8] sm:$0xff] %vm1534_vm12, %v1531_v19 }
 0x23d   : > { %1535 = vst.msk [vmem:[%s206_s7] sm:$0xff] %vm1534_vm12, %v1530_v21 }
 0x23e PF: > { %s13_s16 = sadd.s32 1, %s2258_s16   ;;  %s2687_s12 = smov %s2250_s14 }
 0x23f   : > { %p10_p7 = scmp.ge.s32.totalorder %s13_s16, 6   ;;  %s2688_s13 = smov %s2254_s15 }
 0x240   : > { %s2689_s14 = smov %s2692_s17  ;;  %s2690_s15 = smov %s2696_s18 }
 0x241   :  { %12 = sbr.rel (!%p10_p7) target bundleno = 3 (0x3), region = 277 }

</bundles_post_ra>
